<compile_context>
chip_gen: v7x
topology: tpu7x:2x2x1
jax: 0.10.0
libtpu: 0.0.40
codegen_flags: <defaults>
</compile_context>

<pallas_src>
import functools

import numpy as np
import jax
import jax.numpy as jnp
from jax.experimental import pallas as pl
from jax.experimental.pallas import tpu as pltpu

BN_EPS = 1e-5  # PyTorch BatchNorm2d default eps.
# TODO(synk): running_mean / running_var momentum updates (training-time side
# effects of nn.BatchNorm2d) are not produced; only the forward output is.

_TAPS = tuple((dh, dw) for dh in (-1, 0, 1) for dw in (-1, 0, 1))


def _double_conv_kernel(x_ref, m_ref, w1_ref, g1_ref, be1_ref,
                        w2_ref, g2_ref, be2_ref, out_ref, patch_ref, *, img_w):
    """Fused (conv3x3 -> BN(batch stats) -> ReLU) x 2.

    Layouts (all lane-dense):
      x_ref    : (N, Cin_p, HW)   f32   NCHW view, input channels padded to 8k
      m_ref    : (9, HW)          f32   per-tap border-validity masks
      w1_ref   : (Cout, 9*Cin_p)  bf16  3x3 taps folded into the contraction dim
      w2_ref   : (Cout, 9*Cout)   bf16
      g*_ref, be*_ref : (Cout, 1) f32   BN affine params
      out_ref  : (N, Cout, HW)    f32
      patch_ref: (9*max(Cin_p, Cout), N*HW) bf16 shared im2col scratch
    """
    n, cin_p, hw = x_ref.shape
    cout = out_ref.shape[1]
    p = n * hw

    # Load the 9 border masks once (f32); they implement the conv zero padding
    # (and mask the lane-roll wrap-around) and are reused by both convs.
    masks = [m_ref[t:t + 1, :] for t in range(9)]

    def im2col(get_src, c):
        # Fill rows [0 : 9*c] of the shared bf16 patch.  Row (tap*c + ci), lane
        # slice [i*HW : (i+1)*HW] holds channel ci of image i shifted by
        # (dh, dw), zeroed where the tap falls outside the image.  c is a
        # multiple of 8 and HW a multiple of 128, so every store is aligned.
        for i in range(n):
            src = get_src(i)                                  # (c, HW) f32
            lanes = slice(i * hw, (i + 1) * hw)
            for t, (dh, dw) in enumerate(_TAPS):
                off = dh * img_w + dw
                if off == 0:
                    patch_ref[t * c:(t + 1) * c, lanes] = src.astype(jnp.bfloat16)
                else:
                    shifted = pltpu.roll(src, (-off) % hw, 1)  # XLU lane rotate
                    patch_ref[t * c:(t + 1) * c, lanes] = (
                        (shifted * masks[t]).astype(jnp.bfloat16))

    def conv_bn_relu(c, wt_ref, g_ref, be_ref):
        # One MXU matmul: (Cout, 9*c) @ (9*c, N*HW) -> (Cout, N*HW); bf16
        # operands, f32 accumulation.  (Conv bias omitted: exactly cancelled by
        # train-mode BN's mean subtraction.)
        acc = jnp.dot(wt_ref[...], patch_ref[0:9 * c, :],
                      preferred_element_type=jnp.float32)
        # Train-mode BatchNorm: single-pass batch statistics over all positions.
        inv_p = 1.0 / float(p)
        mean = jnp.sum(acc, axis=1, keepdims=True) * inv_p              # (Cout,1)
        var = jnp.sum(acc * acc, axis=1, keepdims=True) * inv_p - mean * mean
        var = jnp.maximum(var, 0.0)            # guard one-pass E[x^2]-E[x]^2 < 0
        scale = g_ref[...] * jax.lax.rsqrt(var + BN_EPS)                # EUP rsqrt
        return jnp.maximum((acc - mean) * scale + be_ref[...], 0.0)     # ReLU

    # Block 1: sources are the per-image (Cin_p, HW) slabs of the input.
    im2col(lambda i: x_ref[i], cin_p)
    y1 = conv_bn_relu(cin_p, w1_ref, g1_ref, be1_ref)        # (Cout, N*HW) f32

    # Block 2: y1 already lives in (C, N*HW) layout; borders via the same masks.
    im2col(lambda i: y1[:, i * hw:(i + 1) * hw], cout)
    y2 = conv_bn_relu(cout, w2_ref, g2_ref, be2_ref)

    for i in range(n):
        out_ref[i] = y2[:, i * hw:(i + 1) * hw]               # lane-dense store


def _border_masks(h, w):
    """(9, H*W) f32: 1 where tap (dh, dw) stays inside the image, else 0."""
    pos = np.arange(h * w)
    hi, wi = pos // w, pos % w
    rows = []
    for dh, dw in _TAPS:
        valid = (hi + dh >= 0) & (hi + dh < h) & (wi + dw >= 0) & (wi + dw < w)
        rows.append(valid.astype(np.float32))
    return np.stack(rows)


def double_conv(x_nchw, params):
    """Pallas TPU implementation of PyTorch double_conv.forward (training-mode BN).

    x_nchw: (N, Cin, H, W) float32.  Returns (N, Cout, H, W) float32.
    """
    w1, b1, g1, be1, w2, b2, g2, be2 = params
    n, cin, h, w = x_nchw.shape
    cout = w1.shape[-1]
    hw = h * w
    assert hw % 128 == 0, "toy kernel assumes H*W is lane-aligned"
    assert cout % 8 == 0, "toy kernel assumes Cout is sublane-aligned"
    # TODO(synk): general Cout would additionally need output-channel padding.

    cin_p = -(-cin // 8) * 8     # pad input channels to full 8-row sublane groups

    # NCHW -> (N, Cin_p, HW): the reshape is free; the tiny channel pad replaces
    # the old full-activation HBM transpose and vanishes at real channel counts.
    x3 = x_nchw.reshape(n, cin, hw)
    if cin_p != cin:
        x3 = jnp.pad(x3, ((0, 0), (0, cin_p - cin), (0, 0)))

    # Fold the 3x3 taps (and padded input channels) into the contraction dim and
    # cast to bf16 for the MXU.  Row order (kh*3 + kw)*C + ci matches the patch.
    w1_p = w1
    if cin_p != cin:
        w1_p = jnp.pad(w1, ((0, 0), (0, 0), (0, cin_p - cin), (0, 0)))
    w1_2d = w1_p.reshape(9 * cin_p, cout).T.astype(jnp.bfloat16)   # (Cout, 9*Cin_p)
    w2_2d = w2.reshape(9 * cout, cout).T.astype(jnp.bfloat16)      # (Cout, 9*Cout)

    # Conv biases are cancelled exactly by train-mode BN's mean subtraction.
    del b1, b2

    masks = jnp.asarray(_border_masks(h, w))                       # (9, HW) f32
    g1c, be1c = g1.reshape(cout, 1), be1.reshape(cout, 1)
    g2c, be2c = g2.reshape(cout, 1), be2.reshape(cout, 1)

    cmax = max(cin_p, cout)
    vmem = pl.BlockSpec(memory_space=pltpu.MemorySpace.VMEM)
    out3 = pl.pallas_call(
        functools.partial(_double_conv_kernel, img_w=w),
        out_shape=jax.ShapeDtypeStruct((n, cout, hw), jnp.float32),
        in_specs=[vmem] * 8,
        out_specs=vmem,
        scratch_shapes=[pltpu.VMEM((9 * cmax, n * hw), jnp.bfloat16)],
        # Actual resident footprint is a few hundred KiB; generous headroom, well
        # under every generation's physical VMEM (incl. v7x's 64 MiB).
        compiler_params=pltpu.CompilerParams(vmem_limit_bytes=16 * 1024 * 1024),
    )(x3, masks, w1_2d, g1c, be1c, w2_2d, g2c, be2c)

    return out3.reshape(n, cout, h, w)


def double_conv_reference(x_nchw, params, quantize_bf16=False):
    """Pure-JAX reference (matches PyTorch forward in training mode).

    quantize_bf16=True rounds the conv operands to bf16 (exactly what the
    kernel feeds the MXU) so the comparison isolates structural errors.
    """
    w1, b1, g1, be1, w2, b2, g2, be2 = params

    def maybe_q(a):
        return a.astype(jnp.bfloat16).astype(jnp.float32) if quantize_bf16 else a

    def block(x, wt, b, g, be):
        w_oihw = jnp.transpose(wt, (3, 2, 0, 1))
        y = jax.lax.conv_general_dilated(
            maybe_q(x), maybe_q(w_oihw), window_strides=(1, 1),
            padding=((1, 1), (1, 1)),
            dimension_numbers=("NCHW", "OIHW", "NCHW"),
            precision=jax.lax.Precision.HIGHEST)
        y = y + b.reshape(1, -1, 1, 1)
        mean = jnp.mean(y, axis=(0, 2, 3), keepdims=True)
        var = jnp.mean((y - mean) ** 2, axis=(0, 2, 3), keepdims=True)
        y = (y - mean) * (g.reshape(1, -1, 1, 1) / jnp.sqrt(var + BN_EPS)) \
            + be.reshape(1, -1, 1, 1)
        return jnp.maximum(y, 0.0)

    y = block(x_nchw, w1, b1, g1, be1)
    return block(y, w2, b2, g2, be2)


if __name__ == "__main__":
    N, Cin, Cout, H, W = 2, 4, 8, 16, 16

    key = jax.random.PRNGKey(0)
    ks = jax.random.split(key, 10)

    x = jax.random.normal(ks[0], (N, Cin, H, W), jnp.float32)

    # Deterministic synthetic parameters (shapes from nn.Conv2d / nn.BatchNorm2d).
    w1 = 0.1 * jax.random.normal(ks[1], (3, 3, Cin, Cout), jnp.float32)
    b1 = 0.1 * jax.random.normal(ks[2], (Cout,), jnp.float32)
    g1 = 1.0 + 0.1 * jax.random.normal(ks[3], (Cout,), jnp.float32)
    be1 = 0.1 * jax.random.normal(ks[4], (Cout,), jnp.float32)
    w2 = 0.1 * jax.random.normal(ks[5], (3, 3, Cout, Cout), jnp.float32)
    b2 = 0.1 * jax.random.normal(ks[6], (Cout,), jnp.float32)
    g2 = 1.0 + 0.1 * jax.random.normal(ks[7], (Cout,), jnp.float32)
    be2 = 0.1 * jax.random.normal(ks[8], (Cout,), jnp.float32)
    params = (w1, b1, g1, be1, w2, b2, g2, be2)

    out = jax.block_until_ready(double_conv(x, params))
    assert out.shape == (N, Cout, H, W), out.shape

    # Structural check: reference with conv operands rounded to bf16 (matching
    # the kernel's MXU inputs).  Remaining differences are accumulation order
    # and the one-pass variance only, so this is tight.
    ref_q = double_conv_reference(x, params, quantize_bf16=True)
    err_q = float(jnp.max(jnp.abs(out - ref_q)))
    assert err_q < 5e-3, f"structural mismatch vs bf16-matched reference: {err_q}"

    # PyTorch-parity (pure f32) check: only bf16 operand quantization separates
    # the kernel from this reference.
    ref = double_conv_reference(x, params, quantize_bf16=False)
    err = float(jnp.max(jnp.abs(out - ref)))
    assert err < 5e-2, f"mismatch vs f32 reference: {err}"

    print("KERNEL_OK")
</pallas_src>

<mosaic_0001>
module attributes {stable_mosaic.version = 11 : i64} {
  func.func @_double_conv_kernel(%arg0: memref<2x8x256xf32, #tpu.memory_space<vmem>>, %arg1: memref<9x256xf32, #tpu.memory_space<vmem>>, %arg2: memref<8x72xbf16, #tpu.memory_space<vmem>>, %arg3: memref<8x1xf32, #tpu.memory_space<vmem>>, %arg4: memref<8x1xf32, #tpu.memory_space<vmem>>, %arg5: memref<8x72xbf16, #tpu.memory_space<vmem>>, %arg6: memref<8x1xf32, #tpu.memory_space<vmem>>, %arg7: memref<8x1xf32, #tpu.memory_space<vmem>>, %arg8: memref<2x8x256xf32, #tpu.memory_space<vmem>>, %arg9: memref<72x512xbf16, #tpu.memory_space<vmem>>) attributes {dimension_semantics = [], scalar_prefetch = 0 : i64, scratch_operands = 1 : i64, tpu.core_type = #tpu.core_type<tc>} {
    %c0 = arith.constant 0 : index
    %c0_0 = arith.constant 0 : index
    %0 = vector.load %arg1[%c0, %c0_0] : memref<9x256xf32, #tpu.memory_space<vmem>>, vector<1x256xf32>
    %c1 = arith.constant 1 : index
    %c0_1 = arith.constant 0 : index
    %1 = vector.load %arg1[%c1, %c0_1] : memref<9x256xf32, #tpu.memory_space<vmem>>, vector<1x256xf32>
    %c2 = arith.constant 2 : index
    %c0_2 = arith.constant 0 : index
    %2 = vector.load %arg1[%c2, %c0_2] : memref<9x256xf32, #tpu.memory_space<vmem>>, vector<1x256xf32>
    %c3 = arith.constant 3 : index
    %c0_3 = arith.constant 0 : index
    %3 = vector.load %arg1[%c3, %c0_3] : memref<9x256xf32, #tpu.memory_space<vmem>>, vector<1x256xf32>
    %c5 = arith.constant 5 : index
    %c0_4 = arith.constant 0 : index
    %4 = vector.load %arg1[%c5, %c0_4] : memref<9x256xf32, #tpu.memory_space<vmem>>, vector<1x256xf32>
    %c6 = arith.constant 6 : index
    %c0_5 = arith.constant 0 : index
    %5 = vector.load %arg1[%c6, %c0_5] : memref<9x256xf32, #tpu.memory_space<vmem>>, vector<1x256xf32>
    %c7 = arith.constant 7 : index
    %c0_6 = arith.constant 0 : index
    %6 = vector.load %arg1[%c7, %c0_6] : memref<9x256xf32, #tpu.memory_space<vmem>>, vector<1x256xf32>
    %c8 = arith.constant 8 : index
    %c0_7 = arith.constant 0 : index
    %7 = vector.load %arg1[%c8, %c0_7] : memref<9x256xf32, #tpu.memory_space<vmem>>, vector<1x256xf32>
    %c0_8 = arith.constant 0 : index
    %c0_9 = arith.constant 0 : index
    %c0_10 = arith.constant 0 : index
    %8 = vector.load %arg0[%c0_8, %c0_9, %c0_10] : memref<2x8x256xf32, #tpu.memory_space<vmem>>, vector<1x8x256xf32>
    %9 = vector.shape_cast %8 : vector<1x8x256xf32> to vector<8x256xf32>
    %c17_i32 = arith.constant 17 : i32
    %10 = tpu.dynamic_rotate %9 by %c17_i32 dim 1 : vector<8x256xf32>, i32 -> vector<8x256xf32>
    %11 = vector.broadcast %0 : vector<1x256xf32> to vector<8x256xf32>
    %12 = arith.mulf %10, %11 : vector<8x256xf32>
    %13 = arith.truncf %12 : vector<8x256xf32> to vector<8x256xbf16>
    %c0_11 = arith.constant 0 : index
    %c0_12 = arith.constant 0 : index
    %14 = vector.load %arg9[%c0_11, %c0_12] : memref<72x512xbf16, #tpu.memory_space<vmem>>, vector<8x256xbf16>
    tpu.vector_store %arg9[%c0_11, %c0_12], %13 {strides = array<i32>} : memref<72x512xbf16, #tpu.memory_space<vmem>>, vector<8x256xbf16>,
    %c16_i32 = arith.constant 16 : i32
    %15 = tpu.dynamic_rotate %9 by %c16_i32 dim 1 : vector<8x256xf32>, i32 -> vector<8x256xf32>
    %16 = vector.broadcast %1 : vector<1x256xf32> to vector<8x256xf32>
    %17 = arith.mulf %15, %16 : vector<8x256xf32>
    %18 = arith.truncf %17 : vector<8x256xf32> to vector<8x256xbf16>
    %c8_13 = arith.constant 8 : index
    %c0_14 = arith.constant 0 : index
    %19 = vector.load %arg9[%c8_13, %c0_14] : memref<72x512xbf16, #tpu.memory_space<vmem>>, vector<8x256xbf16>
    tpu.vector_store %arg9[%c8_13, %c0_14], %18 {strides = array<i32>} : memref<72x512xbf16, #tpu.memory_space<vmem>>, vector<8x256xbf16>,
    %c15_i32 = arith.constant 15 : i32
    %20 = tpu.dynamic_rotate %9 by %c15_i32 dim 1 : vector<8x256xf32>, i32 -> vector<8x256xf32>
    %21 = vector.broadcast %2 : vector<1x256xf32> to vector<8x256xf32>
    %22 = arith.mulf %20, %21 : vector<8x256xf32>
    %23 = arith.truncf %22 : vector<8x256xf32> to vector<8x256xbf16>
    %c16 = arith.constant 16 : index
    %c0_15 = arith.constant 0 : index
    %24 = vector.load %arg9[%c16, %c0_15] : memref<72x512xbf16, #tpu.memory_space<vmem>>, vector<8x256xbf16>
    tpu.vector_store %arg9[%c16, %c0_15], %23 {strides = array<i32>} : memref<72x512xbf16, #tpu.memory_space<vmem>>, vector<8x256xbf16>,
    %c1_i32 = arith.constant 1 : i32
    %25 = tpu.dynamic_rotate %9 by %c1_i32 dim 1 : vector<8x256xf32>, i32 -> vector<8x256xf32>
    %26 = vector.broadcast %3 : vector<1x256xf32> to vector<8x256xf32>
    %27 = arith.mulf %25, %26 : vector<8x256xf32>
    %28 = arith.truncf %27 : vector<8x256xf32> to vector<8x256xbf16>
    %c24 = arith.constant 24 : index
    %c0_16 = arith.constant 0 : index
    %29 = vector.load %arg9[%c24, %c0_16] : memref<72x512xbf16, #tpu.memory_space<vmem>>, vector<8x256xbf16>
    tpu.vector_store %arg9[%c24, %c0_16], %28 {strides = array<i32>} : memref<72x512xbf16, #tpu.memory_space<vmem>>, vector<8x256xbf16>,
    %30 = arith.truncf %9 : vector<8x256xf32> to vector<8x256xbf16>
    %c32 = arith.constant 32 : index
    %c0_17 = arith.constant 0 : index
    %31 = vector.load %arg9[%c32, %c0_17] : memref<72x512xbf16, #tpu.memory_space<vmem>>, vector<8x256xbf16>
    tpu.vector_store %arg9[%c32, %c0_17], %30 {strides = array<i32>} : memref<72x512xbf16, #tpu.memory_space<vmem>>, vector<8x256xbf16>,
    %c255_i32 = arith.constant 255 : i32
    %32 = tpu.dynamic_rotate %9 by %c255_i32 dim 1 : vector<8x256xf32>, i32 -> vector<8x256xf32>
    %33 = vector.broadcast %4 : vector<1x256xf32> to vector<8x256xf32>
    %34 = arith.mulf %32, %33 : vector<8x256xf32>
    %35 = arith.truncf %34 : vector<8x256xf32> to vector<8x256xbf16>
    %c40 = arith.constant 40 : index
    %c0_18 = arith.constant 0 : index
    %36 = vector.load %arg9[%c40, %c0_18] : memref<72x512xbf16, #tpu.memory_space<vmem>>, vector<8x256xbf16>
    tpu.vector_store %arg9[%c40, %c0_18], %35 {strides = array<i32>} : memref<72x512xbf16, #tpu.memory_space<vmem>>, vector<8x256xbf16>,
    %c241_i32 = arith.constant 241 : i32
    %37 = tpu.dynamic_rotate %9 by %c241_i32 dim 1 : vector<8x256xf32>, i32 -> vector<8x256xf32>
    %38 = vector.broadcast %5 : vector<1x256xf32> to vector<8x256xf32>
    %39 = arith.mulf %37, %38 : vector<8x256xf32>
    %40 = arith.truncf %39 : vector<8x256xf32> to vector<8x256xbf16>
    %c48 = arith.constant 48 : index
    %c0_19 = arith.constant 0 : index
    %41 = vector.load %arg9[%c48, %c0_19] : memref<72x512xbf16, #tpu.memory_space<vmem>>, vector<8x256xbf16>
    tpu.vector_store %arg9[%c48, %c0_19], %40 {strides = array<i32>} : memref<72x512xbf16, #tpu.memory_space<vmem>>, vector<8x256xbf16>,
    %c240_i32 = arith.constant 240 : i32
    %42 = tpu.dynamic_rotate %9 by %c240_i32 dim 1 : vector<8x256xf32>, i32 -> vector<8x256xf32>
    %43 = vector.broadcast %6 : vector<1x256xf32> to vector<8x256xf32>
    %44 = arith.mulf %42, %43 : vector<8x256xf32>
    %45 = arith.truncf %44 : vector<8x256xf32> to vector<8x256xbf16>
    %c56 = arith.constant 56 : index
    %c0_20 = arith.constant 0 : index
    %46 = vector.load %arg9[%c56, %c0_20] : memref<72x512xbf16, #tpu.memory_space<vmem>>, vector<8x256xbf16>
    tpu.vector_store %arg9[%c56, %c0_20], %45 {strides = array<i32>} : memref<72x512xbf16, #tpu.memory_space<vmem>>, vector<8x256xbf16>,
    %c239_i32 = arith.constant 239 : i32
    %47 = tpu.dynamic_rotate %9 by %c239_i32 dim 1 : vector<8x256xf32>, i32 -> vector<8x256xf32>
    %48 = vector.broadcast %7 : vector<1x256xf32> to vector<8x256xf32>
    %49 = arith.mulf %47, %48 : vector<8x256xf32>
    %50 = arith.truncf %49 : vector<8x256xf32> to vector<8x256xbf16>
    %c64 = arith.constant 64 : index
    %c0_21 = arith.constant 0 : index
    %51 = vector.load %arg9[%c64, %c0_21] : memref<72x512xbf16, #tpu.memory_space<vmem>>, vector<8x256xbf16>
    tpu.vector_store %arg9[%c64, %c0_21], %50 {strides = array<i32>} : memref<72x512xbf16, #tpu.memory_space<vmem>>, vector<8x256xbf16>,
    %c1_22 = arith.constant 1 : index
    %c0_23 = arith.constant 0 : index
    %c0_24 = arith.constant 0 : index
    %52 = vector.load %arg0[%c1_22, %c0_23, %c0_24] : memref<2x8x256xf32, #tpu.memory_space<vmem>>, vector<1x8x256xf32>
    %53 = vector.shape_cast %52 : vector<1x8x256xf32> to vector<8x256xf32>
    %c17_i32_25 = arith.constant 17 : i32
    %54 = tpu.dynamic_rotate %53 by %c17_i32_25 dim 1 : vector<8x256xf32>, i32 -> vector<8x256xf32>
    %55 = vector.broadcast %0 : vector<1x256xf32> to vector<8x256xf32>
    %56 = arith.mulf %54, %55 : vector<8x256xf32>
    %57 = arith.truncf %56 : vector<8x256xf32> to vector<8x256xbf16>
    %c0_26 = arith.constant 0 : index
    %c256 = arith.constant 256 : index
    %58 = vector.load %arg9[%c0_26, %c256] : memref<72x512xbf16, #tpu.memory_space<vmem>>, vector<8x256xbf16>
    tpu.vector_store %arg9[%c0_26, %c256], %57 {strides = array<i32>} : memref<72x512xbf16, #tpu.memory_space<vmem>>, vector<8x256xbf16>,
    %c16_i32_27 = arith.constant 16 : i32
    %59 = tpu.dynamic_rotate %53 by %c16_i32_27 dim 1 : vector<8x256xf32>, i32 -> vector<8x256xf32>
    %60 = vector.broadcast %1 : vector<1x256xf32> to vector<8x256xf32>
    %61 = arith.mulf %59, %60 : vector<8x256xf32>
    %62 = arith.truncf %61 : vector<8x256xf32> to vector<8x256xbf16>
    %c8_28 = arith.constant 8 : index
    %c256_29 = arith.constant 256 : index
    %63 = vector.load %arg9[%c8_28, %c256_29] : memref<72x512xbf16, #tpu.memory_space<vmem>>, vector<8x256xbf16>
    tpu.vector_store %arg9[%c8_28, %c256_29], %62 {strides = array<i32>} : memref<72x512xbf16, #tpu.memory_space<vmem>>, vector<8x256xbf16>,
    %c15_i32_30 = arith.constant 15 : i32
    %64 = tpu.dynamic_rotate %53 by %c15_i32_30 dim 1 : vector<8x256xf32>, i32 -> vector<8x256xf32>
    %65 = vector.broadcast %2 : vector<1x256xf32> to vector<8x256xf32>
    %66 = arith.mulf %64, %65 : vector<8x256xf32>
    %67 = arith.truncf %66 : vector<8x256xf32> to vector<8x256xbf16>
    %c16_31 = arith.constant 16 : index
    %c256_32 = arith.constant 256 : index
    %68 = vector.load %arg9[%c16_31, %c256_32] : memref<72x512xbf16, #tpu.memory_space<vmem>>, vector<8x256xbf16>
    tpu.vector_store %arg9[%c16_31, %c256_32], %67 {strides = array<i32>} : memref<72x512xbf16, #tpu.memory_space<vmem>>, vector<8x256xbf16>,
    %c1_i32_33 = arith.constant 1 : i32
    %69 = tpu.dynamic_rotate %53 by %c1_i32_33 dim 1 : vector<8x256xf32>, i32 -> vector<8x256xf32>
    %70 = vector.broadcast %3 : vector<1x256xf32> to vector<8x256xf32>
    %71 = arith.mulf %69, %70 : vector<8x256xf32>
    %72 = arith.truncf %71 : vector<8x256xf32> to vector<8x256xbf16>
    %c24_34 = arith.constant 24 : index
    %c256_35 = arith.constant 256 : index
    %73 = vector.load %arg9[%c24_34, %c256_35] : memref<72x512xbf16, #tpu.memory_space<vmem>>, vector<8x256xbf16>
    tpu.vector_store %arg9[%c24_34, %c256_35], %72 {strides = array<i32>} : memref<72x512xbf16, #tpu.memory_space<vmem>>, vector<8x256xbf16>,
    %74 = arith.truncf %53 : vector<8x256xf32> to vector<8x256xbf16>
    %c32_36 = arith.constant 32 : index
    %c256_37 = arith.constant 256 : index
    %75 = vector.load %arg9[%c32_36, %c256_37] : memref<72x512xbf16, #tpu.memory_space<vmem>>, vector<8x256xbf16>
    tpu.vector_store %arg9[%c32_36, %c256_37], %74 {strides = array<i32>} : memref<72x512xbf16, #tpu.memory_space<vmem>>, vector<8x256xbf16>,
    %c255_i32_38 = arith.constant 255 : i32
    %76 = tpu.dynamic_rotate %53 by %c255_i32_38 dim 1 : vector<8x256xf32>, i32 -> vector<8x256xf32>
    %77 = vector.broadcast %4 : vector<1x256xf32> to vector<8x256xf32>
    %78 = arith.mulf %76, %77 : vector<8x256xf32>
    %79 = arith.truncf %78 : vector<8x256xf32> to vector<8x256xbf16>
    %c40_39 = arith.constant 40 : index
    %c256_40 = arith.constant 256 : index
    %80 = vector.load %arg9[%c40_39, %c256_40] : memref<72x512xbf16, #tpu.memory_space<vmem>>, vector<8x256xbf16>
    tpu.vector_store %arg9[%c40_39, %c256_40], %79 {strides = array<i32>} : memref<72x512xbf16, #tpu.memory_space<vmem>>, vector<8x256xbf16>,
    %c241_i32_41 = arith.constant 241 : i32
    %81 = tpu.dynamic_rotate %53 by %c241_i32_41 dim 1 : vector<8x256xf32>, i32 -> vector<8x256xf32>
    %82 = vector.broadcast %5 : vector<1x256xf32> to vector<8x256xf32>
    %83 = arith.mulf %81, %82 : vector<8x256xf32>
    %84 = arith.truncf %83 : vector<8x256xf32> to vector<8x256xbf16>
    %c48_42 = arith.constant 48 : index
    %c256_43 = arith.constant 256 : index
    %85 = vector.load %arg9[%c48_42, %c256_43] : memref<72x512xbf16, #tpu.memory_space<vmem>>, vector<8x256xbf16>
    tpu.vector_store %arg9[%c48_42, %c256_43], %84 {strides = array<i32>} : memref<72x512xbf16, #tpu.memory_space<vmem>>, vector<8x256xbf16>,
    %c240_i32_44 = arith.constant 240 : i32
    %86 = tpu.dynamic_rotate %53 by %c240_i32_44 dim 1 : vector<8x256xf32>, i32 -> vector<8x256xf32>
    %87 = vector.broadcast %6 : vector<1x256xf32> to vector<8x256xf32>
    %88 = arith.mulf %86, %87 : vector<8x256xf32>
    %89 = arith.truncf %88 : vector<8x256xf32> to vector<8x256xbf16>
    %c56_45 = arith.constant 56 : index
    %c256_46 = arith.constant 256 : index
    %90 = vector.load %arg9[%c56_45, %c256_46] : memref<72x512xbf16, #tpu.memory_space<vmem>>, vector<8x256xbf16>
    tpu.vector_store %arg9[%c56_45, %c256_46], %89 {strides = array<i32>} : memref<72x512xbf16, #tpu.memory_space<vmem>>, vector<8x256xbf16>,
    %c239_i32_47 = arith.constant 239 : i32
    %91 = tpu.dynamic_rotate %53 by %c239_i32_47 dim 1 : vector<8x256xf32>, i32 -> vector<8x256xf32>
    %92 = vector.broadcast %7 : vector<1x256xf32> to vector<8x256xf32>
    %93 = arith.mulf %91, %92 : vector<8x256xf32>
    %94 = arith.truncf %93 : vector<8x256xf32> to vector<8x256xbf16>
    %c64_48 = arith.constant 64 : index
    %c256_49 = arith.constant 256 : index
    %95 = vector.load %arg9[%c64_48, %c256_49] : memref<72x512xbf16, #tpu.memory_space<vmem>>, vector<8x256xbf16>
    tpu.vector_store %arg9[%c64_48, %c256_49], %94 {strides = array<i32>} : memref<72x512xbf16, #tpu.memory_space<vmem>>, vector<8x256xbf16>,
    %c0_50 = arith.constant 0 : index
    %c0_51 = arith.constant 0 : index
    %96 = vector.load %arg2[%c0_50, %c0_51] : memref<8x72xbf16, #tpu.memory_space<vmem>>, vector<8x72xbf16>
    %c0_52 = arith.constant 0 : index
    %c0_53 = arith.constant 0 : index
    %97 = vector.load %arg9[%c0_52, %c0_53] : memref<72x512xbf16, #tpu.memory_space<vmem>>, vector<72x512xbf16>
    %cst = arith.constant dense<0.000000e+00> : vector<8x512xf32>
    %98 = tpu.matmul %96, %97, %cst {dimension_numbers = #tpu.dot_dimension_numbers<[1], [0], [0], [1], [0, 0, 1, 1], [], []>} : vector<8x72xbf16>, vector<72x512xbf16>, vector<8x512xf32> -> vector<8x512xf32>
    %cst_54 = arith.constant dense<0.000000e+00> : vector<8xf32>
    %99 = vector.multi_reduction <add>, %98, %cst_54 [1] : vector<8x512xf32> to vector<8xf32>
    %100 = vector.shape_cast %99 : vector<8xf32> to vector<8x1xf32>
    %cst_55 = arith.constant 0.001953125 : f32
    %101 = vector.broadcast %cst_55 : f32 to vector<8x1xf32>
    %102 = arith.mulf %100, %101 : vector<8x1xf32>
    %103 = arith.mulf %98, %98 : vector<8x512xf32>
    %cst_56 = arith.constant dense<0.000000e+00> : vector<8xf32>
    %104 = vector.multi_reduction <add>, %103, %cst_56 [1] : vector<8x512xf32> to vector<8xf32>
    %105 = vector.shape_cast %104 : vector<8xf32> to vector<8x1xf32>
    %cst_57 = arith.constant 0.001953125 : f32
    %106 = vector.broadcast %cst_57 : f32 to vector<8x1xf32>
    %107 = arith.mulf %105, %106 : vector<8x1xf32>
    %108 = arith.mulf %102, %102 : vector<8x1xf32>
    %109 = arith.subf %107, %108 : vector<8x1xf32>
    %cst_58 = arith.constant 0.000000e+00 : f32
    %110 = vector.broadcast %cst_58 : f32 to vector<8x1xf32>
    %111 = arith.maximumf %109, %110 : vector<8x1xf32>
    %c0_59 = arith.constant 0 : index
    %c0_60 = arith.constant 0 : index
    %112 = vector.load %arg3[%c0_59, %c0_60] : memref<8x1xf32, #tpu.memory_space<vmem>>, vector<8x1xf32>
    %cst_61 = arith.constant 9.99999974E-6 : f32
    %113 = vector.broadcast %cst_61 : f32 to vector<8x1xf32>
    %114 = arith.addf %111, %113 : vector<8x1xf32>
    %115 = math.rsqrt %114 : vector<8x1xf32>
    %116 = arith.mulf %112, %115 : vector<8x1xf32>
    %117 = vector.broadcast %102 : vector<8x1xf32> to vector<8x512xf32>
    %118 = arith.subf %98, %117 : vector<8x512xf32>
    %119 = vector.broadcast %116 : vector<8x1xf32> to vector<8x512xf32>
    %120 = arith.mulf %118, %119 : vector<8x512xf32>
    %c0_62 = arith.constant 0 : index
    %c0_63 = arith.constant 0 : index
    %121 = vector.load %arg4[%c0_62, %c0_63] : memref<8x1xf32, #tpu.memory_space<vmem>>, vector<8x1xf32>
    %122 = vector.broadcast %121 : vector<8x1xf32> to vector<8x512xf32>
    %123 = arith.addf %120, %122 : vector<8x512xf32>
    %cst_64 = arith.constant 0.000000e+00 : f32
    %124 = vector.broadcast %cst_64 : f32 to vector<8x512xf32>
    %125 = arith.maximumf %123, %124 : vector<8x512xf32>
    %126 = vector.extract_strided_slice %125 {offsets = [0, 0], sizes = [8, 256], strides = [1, 1]} : vector<8x512xf32> to vector<8x256xf32>
    %c17_i32_65 = arith.constant 17 : i32
    %127 = tpu.dynamic_rotate %126 by %c17_i32_65 dim 1 : vector<8x256xf32>, i32 -> vector<8x256xf32>
    %128 = vector.broadcast %0 : vector<1x256xf32> to vector<8x256xf32>
    %129 = arith.mulf %127, %128 : vector<8x256xf32>
    %130 = arith.truncf %129 : vector<8x256xf32> to vector<8x256xbf16>
    %c0_66 = arith.constant 0 : index
    %c0_67 = arith.constant 0 : index
    %131 = vector.load %arg9[%c0_66, %c0_67] : memref<72x512xbf16, #tpu.memory_space<vmem>>, vector<8x256xbf16>
    tpu.vector_store %arg9[%c0_66, %c0_67], %130 {strides = array<i32>} : memref<72x512xbf16, #tpu.memory_space<vmem>>, vector<8x256xbf16>,
    %c16_i32_68 = arith.constant 16 : i32
    %132 = tpu.dynamic_rotate %126 by %c16_i32_68 dim 1 : vector<8x256xf32>, i32 -> vector<8x256xf32>
    %133 = vector.broadcast %1 : vector<1x256xf32> to vector<8x256xf32>
    %134 = arith.mulf %132, %133 : vector<8x256xf32>
    %135 = arith.truncf %134 : vector<8x256xf32> to vector<8x256xbf16>
    %c8_69 = arith.constant 8 : index
    %c0_70 = arith.constant 0 : index
    %136 = vector.load %arg9[%c8_69, %c0_70] : memref<72x512xbf16, #tpu.memory_space<vmem>>, vector<8x256xbf16>
    tpu.vector_store %arg9[%c8_69, %c0_70], %135 {strides = array<i32>} : memref<72x512xbf16, #tpu.memory_space<vmem>>, vector<8x256xbf16>,
    %c15_i32_71 = arith.constant 15 : i32
    %137 = tpu.dynamic_rotate %126 by %c15_i32_71 dim 1 : vector<8x256xf32>, i32 -> vector<8x256xf32>
    %138 = vector.broadcast %2 : vector<1x256xf32> to vector<8x256xf32>
    %139 = arith.mulf %137, %138 : vector<8x256xf32>
    %140 = arith.truncf %139 : vector<8x256xf32> to vector<8x256xbf16>
    %c16_72 = arith.constant 16 : index
    %c0_73 = arith.constant 0 : index
    %141 = vector.load %arg9[%c16_72, %c0_73] : memref<72x512xbf16, #tpu.memory_space<vmem>>, vector<8x256xbf16>
    tpu.vector_store %arg9[%c16_72, %c0_73], %140 {strides = array<i32>} : memref<72x512xbf16, #tpu.memory_space<vmem>>, vector<8x256xbf16>,
    %c1_i32_74 = arith.constant 1 : i32
    %142 = tpu.dynamic_rotate %126 by %c1_i32_74 dim 1 : vector<8x256xf32>, i32 -> vector<8x256xf32>
    %143 = vector.broadcast %3 : vector<1x256xf32> to vector<8x256xf32>
    %144 = arith.mulf %142, %143 : vector<8x256xf32>
    %145 = arith.truncf %144 : vector<8x256xf32> to vector<8x256xbf16>
    %c24_75 = arith.constant 24 : index
    %c0_76 = arith.constant 0 : index
    %146 = vector.load %arg9[%c24_75, %c0_76] : memref<72x512xbf16, #tpu.memory_space<vmem>>, vector<8x256xbf16>
    tpu.vector_store %arg9[%c24_75, %c0_76], %145 {strides = array<i32>} : memref<72x512xbf16, #tpu.memory_space<vmem>>, vector<8x256xbf16>,
    %147 = arith.truncf %126 : vector<8x256xf32> to vector<8x256xbf16>
    %c32_77 = arith.constant 32 : index
    %c0_78 = arith.constant 0 : index
    %148 = vector.load %arg9[%c32_77, %c0_78] : memref<72x512xbf16, #tpu.memory_space<vmem>>, vector<8x256xbf16>
    tpu.vector_store %arg9[%c32_77, %c0_78], %147 {strides = array<i32>} : memref<72x512xbf16, #tpu.memory_space<vmem>>, vector<8x256xbf16>,
    %c255_i32_79 = arith.constant 255 : i32
    %149 = tpu.dynamic_rotate %126 by %c255_i32_79 dim 1 : vector<8x256xf32>, i32 -> vector<8x256xf32>
    %150 = vector.broadcast %4 : vector<1x256xf32> to vector<8x256xf32>
    %151 = arith.mulf %149, %150 : vector<8x256xf32>
    %152 = arith.truncf %151 : vector<8x256xf32> to vector<8x256xbf16>
    %c40_80 = arith.constant 40 : index
    %c0_81 = arith.constant 0 : index
    %153 = vector.load %arg9[%c40_80, %c0_81] : memref<72x512xbf16, #tpu.memory_space<vmem>>, vector<8x256xbf16>
    tpu.vector_store %arg9[%c40_80, %c0_81], %152 {strides = array<i32>} : memref<72x512xbf16, #tpu.memory_space<vmem>>, vector<8x256xbf16>,
    %c241_i32_82 = arith.constant 241 : i32
    %154 = tpu.dynamic_rotate %126 by %c241_i32_82 dim 1 : vector<8x256xf32>, i32 -> vector<8x256xf32>
    %155 = vector.broadcast %5 : vector<1x256xf32> to vector<8x256xf32>
    %156 = arith.mulf %154, %155 : vector<8x256xf32>
    %157 = arith.truncf %156 : vector<8x256xf32> to vector<8x256xbf16>
    %c48_83 = arith.constant 48 : index
    %c0_84 = arith.constant 0 : index
    %158 = vector.load %arg9[%c48_83, %c0_84] : memref<72x512xbf16, #tpu.memory_space<vmem>>, vector<8x256xbf16>
    tpu.vector_store %arg9[%c48_83, %c0_84], %157 {strides = array<i32>} : memref<72x512xbf16, #tpu.memory_space<vmem>>, vector<8x256xbf16>,
    %c240_i32_85 = arith.constant 240 : i32
    %159 = tpu.dynamic_rotate %126 by %c240_i32_85 dim 1 : vector<8x256xf32>, i32 -> vector<8x256xf32>
    %160 = vector.broadcast %6 : vector<1x256xf32> to vector<8x256xf32>
    %161 = arith.mulf %159, %160 : vector<8x256xf32>
    %162 = arith.truncf %161 : vector<8x256xf32> to vector<8x256xbf16>
    %c56_86 = arith.constant 56 : index
    %c0_87 = arith.constant 0 : index
    %163 = vector.load %arg9[%c56_86, %c0_87] : memref<72x512xbf16, #tpu.memory_space<vmem>>, vector<8x256xbf16>
    tpu.vector_store %arg9[%c56_86, %c0_87], %162 {strides = array<i32>} : memref<72x512xbf16, #tpu.memory_space<vmem>>, vector<8x256xbf16>,
    %c239_i32_88 = arith.constant 239 : i32
    %164 = tpu.dynamic_rotate %126 by %c239_i32_88 dim 1 : vector<8x256xf32>, i32 -> vector<8x256xf32>
    %165 = vector.broadcast %7 : vector<1x256xf32> to vector<8x256xf32>
    %166 = arith.mulf %164, %165 : vector<8x256xf32>
    %167 = arith.truncf %166 : vector<8x256xf32> to vector<8x256xbf16>
    %c64_89 = arith.constant 64 : index
    %c0_90 = arith.constant 0 : index
    %168 = vector.load %arg9[%c64_89, %c0_90] : memref<72x512xbf16, #tpu.memory_space<vmem>>, vector<8x256xbf16>
    tpu.vector_store %arg9[%c64_89, %c0_90], %167 {strides = array<i32>} : memref<72x512xbf16, #tpu.memory_space<vmem>>, vector<8x256xbf16>,
    %169 = vector.extract_strided_slice %125 {offsets = [0, 256], sizes = [8, 256], strides = [1, 1]} : vector<8x512xf32> to vector<8x256xf32>
    %c17_i32_91 = arith.constant 17 : i32
    %170 = tpu.dynamic_rotate %169 by %c17_i32_91 dim 1 : vector<8x256xf32>, i32 -> vector<8x256xf32>
    %171 = vector.broadcast %0 : vector<1x256xf32> to vector<8x256xf32>
    %172 = arith.mulf %170, %171 : vector<8x256xf32>
    %173 = arith.truncf %172 : vector<8x256xf32> to vector<8x256xbf16>
    %c0_92 = arith.constant 0 : index
    %c256_93 = arith.constant 256 : index
    %174 = vector.load %arg9[%c0_92, %c256_93] : memref<72x512xbf16, #tpu.memory_space<vmem>>, vector<8x256xbf16>
    tpu.vector_store %arg9[%c0_92, %c256_93], %173 {strides = array<i32>} : memref<72x512xbf16, #tpu.memory_space<vmem>>, vector<8x256xbf16>,
    %c16_i32_94 = arith.constant 16 : i32
    %175 = tpu.dynamic_rotate %169 by %c16_i32_94 dim 1 : vector<8x256xf32>, i32 -> vector<8x256xf32>
    %176 = vector.broadcast %1 : vector<1x256xf32> to vector<8x256xf32>
    %177 = arith.mulf %175, %176 : vector<8x256xf32>
    %178 = arith.truncf %177 : vector<8x256xf32> to vector<8x256xbf16>
    %c8_95 = arith.constant 8 : index
    %c256_96 = arith.constant 256 : index
    %179 = vector.load %arg9[%c8_95, %c256_96] : memref<72x512xbf16, #tpu.memory_space<vmem>>, vector<8x256xbf16>
    tpu.vector_store %arg9[%c8_95, %c256_96], %178 {strides = array<i32>} : memref<72x512xbf16, #tpu.memory_space<vmem>>, vector<8x256xbf16>,
    %c15_i32_97 = arith.constant 15 : i32
    %180 = tpu.dynamic_rotate %169 by %c15_i32_97 dim 1 : vector<8x256xf32>, i32 -> vector<8x256xf32>
    %181 = vector.broadcast %2 : vector<1x256xf32> to vector<8x256xf32>
    %182 = arith.mulf %180, %181 : vector<8x256xf32>
    %183 = arith.truncf %182 : vector<8x256xf32> to vector<8x256xbf16>
    %c16_98 = arith.constant 16 : index
    %c256_99 = arith.constant 256 : index
    %184 = vector.load %arg9[%c16_98, %c256_99] : memref<72x512xbf16, #tpu.memory_space<vmem>>, vector<8x256xbf16>
    tpu.vector_store %arg9[%c16_98, %c256_99], %183 {strides = array<i32>} : memref<72x512xbf16, #tpu.memory_space<vmem>>, vector<8x256xbf16>,
    %c1_i32_100 = arith.constant 1 : i32
    %185 = tpu.dynamic_rotate %169 by %c1_i32_100 dim 1 : vector<8x256xf32>, i32 -> vector<8x256xf32>
    %186 = vector.broadcast %3 : vector<1x256xf32> to vector<8x256xf32>
    %187 = arith.mulf %185, %186 : vector<8x256xf32>
    %188 = arith.truncf %187 : vector<8x256xf32> to vector<8x256xbf16>
    %c24_101 = arith.constant 24 : index
    %c256_102 = arith.constant 256 : index
    %189 = vector.load %arg9[%c24_101, %c256_102] : memref<72x512xbf16, #tpu.memory_space<vmem>>, vector<8x256xbf16>
    tpu.vector_store %arg9[%c24_101, %c256_102], %188 {strides = array<i32>} : memref<72x512xbf16, #tpu.memory_space<vmem>>, vector<8x256xbf16>,
    %190 = arith.truncf %169 : vector<8x256xf32> to vector<8x256xbf16>
    %c32_103 = arith.constant 32 : index
    %c256_104 = arith.constant 256 : index
    %191 = vector.load %arg9[%c32_103, %c256_104] : memref<72x512xbf16, #tpu.memory_space<vmem>>, vector<8x256xbf16>
    tpu.vector_store %arg9[%c32_103, %c256_104], %190 {strides = array<i32>} : memref<72x512xbf16, #tpu.memory_space<vmem>>, vector<8x256xbf16>,
    %c255_i32_105 = arith.constant 255 : i32
    %192 = tpu.dynamic_rotate %169 by %c255_i32_105 dim 1 : vector<8x256xf32>, i32 -> vector<8x256xf32>
    %193 = vector.broadcast %4 : vector<1x256xf32> to vector<8x256xf32>
    %194 = arith.mulf %192, %193 : vector<8x256xf32>
    %195 = arith.truncf %194 : vector<8x256xf32> to vector<8x256xbf16>
    %c40_106 = arith.constant 40 : index
    %c256_107 = arith.constant 256 : index
    %196 = vector.load %arg9[%c40_106, %c256_107] : memref<72x512xbf16, #tpu.memory_space<vmem>>, vector<8x256xbf16>
    tpu.vector_store %arg9[%c40_106, %c256_107], %195 {strides = array<i32>} : memref<72x512xbf16, #tpu.memory_space<vmem>>, vector<8x256xbf16>,
    %c241_i32_108 = arith.constant 241 : i32
    %197 = tpu.dynamic_rotate %169 by %c241_i32_108 dim 1 : vector<8x256xf32>, i32 -> vector<8x256xf32>
    %198 = vector.broadcast %5 : vector<1x256xf32> to vector<8x256xf32>
    %199 = arith.mulf %197, %198 : vector<8x256xf32>
    %200 = arith.truncf %199 : vector<8x256xf32> to vector<8x256xbf16>
    %c48_109 = arith.constant 48 : index
    %c256_110 = arith.constant 256 : index
    %201 = vector.load %arg9[%c48_109, %c256_110] : memref<72x512xbf16, #tpu.memory_space<vmem>>, vector<8x256xbf16>
    tpu.vector_store %arg9[%c48_109, %c256_110], %200 {strides = array<i32>} : memref<72x512xbf16, #tpu.memory_space<vmem>>, vector<8x256xbf16>,
    %c240_i32_111 = arith.constant 240 : i32
    %202 = tpu.dynamic_rotate %169 by %c240_i32_111 dim 1 : vector<8x256xf32>, i32 -> vector<8x256xf32>
    %203 = vector.broadcast %6 : vector<1x256xf32> to vector<8x256xf32>
    %204 = arith.mulf %202, %203 : vector<8x256xf32>
    %205 = arith.truncf %204 : vector<8x256xf32> to vector<8x256xbf16>
    %c56_112 = arith.constant 56 : index
    %c256_113 = arith.constant 256 : index
    %206 = vector.load %arg9[%c56_112, %c256_113] : memref<72x512xbf16, #tpu.memory_space<vmem>>, vector<8x256xbf16>
    tpu.vector_store %arg9[%c56_112, %c256_113], %205 {strides = array<i32>} : memref<72x512xbf16, #tpu.memory_space<vmem>>, vector<8x256xbf16>,
    %c239_i32_114 = arith.constant 239 : i32
    %207 = tpu.dynamic_rotate %169 by %c239_i32_114 dim 1 : vector<8x256xf32>, i32 -> vector<8x256xf32>
    %208 = vector.broadcast %7 : vector<1x256xf32> to vector<8x256xf32>
    %209 = arith.mulf %207, %208 : vector<8x256xf32>
    %210 = arith.truncf %209 : vector<8x256xf32> to vector<8x256xbf16>
    %c64_115 = arith.constant 64 : index
    %c256_116 = arith.constant 256 : index
    %211 = vector.load %arg9[%c64_115, %c256_116] : memref<72x512xbf16, #tpu.memory_space<vmem>>, vector<8x256xbf16>
    tpu.vector_store %arg9[%c64_115, %c256_116], %210 {strides = array<i32>} : memref<72x512xbf16, #tpu.memory_space<vmem>>, vector<8x256xbf16>,
    %c0_117 = arith.constant 0 : index
    %c0_118 = arith.constant 0 : index
    %212 = vector.load %arg5[%c0_117, %c0_118] : memref<8x72xbf16, #tpu.memory_space<vmem>>, vector<8x72xbf16>
    %c0_119 = arith.constant 0 : index
    %c0_120 = arith.constant 0 : index
    %213 = vector.load %arg9[%c0_119, %c0_120] : memref<72x512xbf16, #tpu.memory_space<vmem>>, vector<72x512xbf16>
    %cst_121 = arith.constant dense<0.000000e+00> : vector<8x512xf32>
    %214 = tpu.matmul %212, %213, %cst_121 {dimension_numbers = #tpu.dot_dimension_numbers<[1], [0], [0], [1], [0, 0, 1, 1], [], []>} : vector<8x72xbf16>, vector<72x512xbf16>, vector<8x512xf32> -> vector<8x512xf32>
    %cst_122 = arith.constant dense<0.000000e+00> : vector<8xf32>
    %215 = vector.multi_reduction <add>, %214, %cst_122 [1] : vector<8x512xf32> to vector<8xf32>
    %216 = vector.shape_cast %215 : vector<8xf32> to vector<8x1xf32>
    %cst_123 = arith.constant 0.001953125 : f32
    %217 = vector.broadcast %cst_123 : f32 to vector<8x1xf32>
    %218 = arith.mulf %216, %217 : vector<8x1xf32>
    %219 = arith.mulf %214, %214 : vector<8x512xf32>
    %cst_124 = arith.constant dense<0.000000e+00> : vector<8xf32>
    %220 = vector.multi_reduction <add>, %219, %cst_124 [1] : vector<8x512xf32> to vector<8xf32>
    %221 = vector.shape_cast %220 : vector<8xf32> to vector<8x1xf32>
    %cst_125 = arith.constant 0.001953125 : f32
    %222 = vector.broadcast %cst_125 : f32 to vector<8x1xf32>
    %223 = arith.mulf %221, %222 : vector<8x1xf32>
    %224 = arith.mulf %218, %218 : vector<8x1xf32>
    %225 = arith.subf %223, %224 : vector<8x1xf32>
    %cst_126 = arith.constant 0.000000e+00 : f32
    %226 = vector.broadcast %cst_126 : f32 to vector<8x1xf32>
    %227 = arith.maximumf %225, %226 : vector<8x1xf32>
    %c0_127 = arith.constant 0 : index
    %c0_128 = arith.constant 0 : index
    %228 = vector.load %arg6[%c0_127, %c0_128] : memref<8x1xf32, #tpu.memory_space<vmem>>, vector<8x1xf32>
    %cst_129 = arith.constant 9.99999974E-6 : f32
    %229 = vector.broadcast %cst_129 : f32 to vector<8x1xf32>
    %230 = arith.addf %227, %229 : vector<8x1xf32>
    %231 = math.rsqrt %230 : vector<8x1xf32>
    %232 = arith.mulf %228, %231 : vector<8x1xf32>
    %233 = vector.broadcast %218 : vector<8x1xf32> to vector<8x512xf32>
    %234 = arith.subf %214, %233 : vector<8x512xf32>
    %235 = vector.broadcast %232 : vector<8x1xf32> to vector<8x512xf32>
    %236 = arith.mulf %234, %235 : vector<8x512xf32>
    %c0_130 = arith.constant 0 : index
    %c0_131 = arith.constant 0 : index
    %237 = vector.load %arg7[%c0_130, %c0_131] : memref<8x1xf32, #tpu.memory_space<vmem>>, vector<8x1xf32>
    %238 = vector.broadcast %237 : vector<8x1xf32> to vector<8x512xf32>
    %239 = arith.addf %236, %238 : vector<8x512xf32>
    %cst_132 = arith.constant 0.000000e+00 : f32
    %240 = vector.broadcast %cst_132 : f32 to vector<8x512xf32>
    %241 = arith.maximumf %239, %240 : vector<8x512xf32>
    %242 = vector.extract_strided_slice %241 {offsets = [0, 0], sizes = [8, 256], strides = [1, 1]} : vector<8x512xf32> to vector<8x256xf32>
    %c0_133 = arith.constant 0 : index
    %c0_134 = arith.constant 0 : index
    %c0_135 = arith.constant 0 : index
    %243 = vector.load %arg8[%c0_133, %c0_134, %c0_135] : memref<2x8x256xf32, #tpu.memory_space<vmem>>, vector<1x8x256xf32>
    %244 = vector.shape_cast %243 : vector<1x8x256xf32> to vector<8x256xf32>
    %245 = vector.shape_cast %242 : vector<8x256xf32> to vector<1x8x256xf32>
    tpu.vector_store %arg8[%c0_133, %c0_134, %c0_135], %245 {strides = array<i32>} : memref<2x8x256xf32, #tpu.memory_space<vmem>>, vector<1x8x256xf32>,
    %246 = vector.extract_strided_slice %241 {offsets = [0, 256], sizes = [8, 256], strides = [1, 1]} : vector<8x512xf32> to vector<8x256xf32>
    %c1_136 = arith.constant 1 : index
    %c0_137 = arith.constant 0 : index
    %c0_138 = arith.constant 0 : index
    %247 = vector.load %arg8[%c1_136, %c0_137, %c0_138] : memref<2x8x256xf32, #tpu.memory_space<vmem>>, vector<1x8x256xf32>
    %248 = vector.shape_cast %247 : vector<1x8x256xf32> to vector<8x256xf32>
    %249 = vector.shape_cast %246 : vector<8x256xf32> to vector<1x8x256xf32>
    tpu.vector_store %arg8[%c1_136, %c0_137, %c0_138], %249 {strides = array<i32>} : memref<2x8x256xf32, #tpu.memory_space<vmem>>, vector<1x8x256xf32>,
    return
  }
}

</mosaic_0001>

<bundles_post_ra>
// kernel: tpu_custom_call.1
= control target key start
LH: loop header
LB: loop body
LE: loop exit
PB: predicated region body
PF: predicated region fallthrough
CT: control target
= control target key end

     0   :  { %13 = vsyncpa [#allocation4], 0  ;;  %s2048_s0 = inlined_call_operand.vmem [shape: f32[2,8,256], index: 0, kind: input, shape index: {}]   ;;  %s2049_s1 = inlined_call_operand.hbm [shape: f32[9,256], index: 1, kind: input, shape index: {}]   ;;  %s2050_s2 = inlined_call_operand.vmem [shape: bf16[8,72], index: 2, kind: input, shape index: {}]   ;;  %s2051_s3 = inlined_call_operand.vmem [shape: f32[8,1], index: 3, kind: input, shape index: {}]   ;;  %s2052_s4 = inlined_call_operand.vmem [shape: f32[8,1], index: 4, kind: input, shape index: {}]   ;;  %s2053_s5 = inlined_call_operand.vmem [shape: bf16[8,72], index: 5, kind: input, shape index: {}]   ;;  %s2054_s6 = inlined_call_operand.vmem [shape: f32[8,1], index: 6, kind: input, shape index: {}]   ;;  %s2055_s7 = inlined_call_operand.vmem [shape: f32[8,1], index: 7, kind: input, shape index: {}]   ;;  %s2056_s8 = inlined_call_operand.hbm [shape: f32[2,8,256], index: 8, kind: output, shape index: {}]  }
   0x1   :  { %14 = vsyncpa [#allocation5], 0  ;;  %s1507_s27 = smov [#allocation3]   ;;  %s1459_s9 = scalar_lea.hbm %s2049_s1, 512 }
   0x2   :  { %s22_s28 = sshll.u32 %s1507_s27, 4  ;;  %p1460_p0 = scmp.ne.s32.totalorder %s2049_s1, %s1459_s9  ;;  %s23_s28 = int_to_ptr.vmem [resolvable:$true] %s22_s28 }
   0x3   :  { %p1463_p1 = scmp.lt.u32.totalorder %s1459_s9, %s2049_s1 }
   0x5   :  { %p1465_p2 = pnand %p1463_p1, %p1460_p0 }
   0x7   :  { %1468 = shalt.err (!%p1465_p2)
}
   0x8   :  { %s1469_s14 = scalar_lea.vmem %s23_s28, 512  ;;  %p1474_p4 = scmp.lt.s32.totalorder %s23_s28, %s23_s28 }
   0x9   :  { %p1470_p3 = scmp.ne.s32.totalorder %s23_s28, %s1469_s14  ;;  %p1475_p5 = scmp.lt.s32.totalorder %s1469_s14, %s1469_s14 }
   0xb   :  { %p1476_p6 = por %p1475_p5, %p1474_p4 }
   0xd   :  { %p1477_p7 = pnand %p1476_p6, %p1470_p3 }
   0xf   :  { %1480 = shalt.err (!%p1477_p7)
}
  0x10   :  { %s1508_s15 = smov 256   ;;  %s1509_s16 = smov 16  }
  0x11   :  { %28 = dma.hbm_to_vmem [thread:$0]  %s2049_s1, 512, %s23_s28, [#allocation4], %s1508_s15, %s1508_s15, %s1509_s16  }
  0x12   :  { %1503 = dma.done.wait [#allocation4], 512  }
  0x13   :  { %1504 = vsyncadd [#allocation4], 4294966784  ;;  %v1582_v0 = vld [vmem:[%s2048_s0] sm:$0xff]  ;;  %s1510_s21 = smov 17   ;;  %v1591_v1 = vld [vmem:[%s2048_s0 + $0x8] sm:$0xff]  ;;  %s1511_s27 = smov 15   ;;  %v66_v5 = vlaneseq }
  0x14   :  { %93 = vrot.lane.b32.xlu1 %v1582_v0, %s1509_s16  ;;  %62 = vrot.lane.b32.xlu0 %v1582_v0, %s1510_s21  ;;  %v1600_v2 = vld [vmem:[%s2048_s0 + $0x18] sm:$0xff]  ;;  %v1605_v3 = vld [vmem:[%s2048_s0 + $0x10] sm:$0xff]  ;;  %s1512_s0 = smov 1   ;;  %s1513_s28 = smov 127   ;;  %v1516_v4 = vmov 0   ;;  %vm566_vm8 = vcmask 1043456  }
  0x15   :  { %s1514_s29 = smov 113   ;;  %s1515_s30 = smov 112   ;;  %611 = vmatprep.mubr.bf16.mxu0 %v1516_v4  ;;  %652 = vmatprep.mubr.bf16.mxu1 %v1516_v4  ;;  %v73_v6 = vshrl.u32 %v66_v5, 7  ;;  %v1667_v7 = vand.u32 127, %v66_v5  ;;  %vm562_vm9 = vcmask 588800  }
  0x16   :  { %1453 = vset.pattern.permute.xlu0 %v1516_v4  ;;  %1454 = vset.pattern.permute.xlu1 %v1516_v4  ;;  %s1517_s9 = smov 111   ;;  %v47_v10 = vld [vmem:[#allocation3 + $0x1] ss:$8 sm:$0x3] }
  0x17   :  { %v1669_v8 = vsub.s32 0, %v73_v6  ;;  %v1671_v9 = vsub.s32 1, %v73_v6  ;;  %v45_v11 = vld [vmem:[#allocation3] ss:$8 sm:$0x3]  ;;  %vm97_vm0 = vcmp.lt.s32.totalorder %v1667_v7, 16 }
  0x18   :  { %95 = vrot.lane.b32.xlu1 %v1591_v1, %s1509_s16  ;;  %64 = vrot.lane.b32.xlu0 %v1591_v1, %s1510_s21  ;;  %vm68_vm1 = vcmp.lt.s32.totalorder %v1667_v7, 17  ;;  %v49_v40 = vld [vmem:[#allocation3 + $0x2] ss:$8 sm:$0x3]  ;;  %vm126_vm2 = vcmp.lt.s32.totalorder %v1667_v7, 15  ;;  %vm155_vm3 = vcmp.lt.s32.totalorder %v1667_v7, 1 }
  0x19   :  { %v1676_v14 = vrot.slane %v47_v10, %v1669_v8  ;;  %v1679_v15 = vrot.slane %v45_v11, %v1669_v8  ;;  %v1682_v16 = vrot.slane %v45_v11, %v1671_v9  ;;  %v1685_v17 = vrot.slane %v47_v10, %v1671_v9  ;;  %v51_v43 = vld [vmem:[#allocation3 + $0x3] ss:$8 sm:$0x3]  ;;  %v53_v10 = vld [vmem:[#allocation3 + $0x5] ss:$8 sm:$0x3] }
  0x1a   :  { %v1713_v48 = vrot.slane %v49_v40, %v1669_v8  ;;  %v1716_v49 = vrot.slane %v49_v40, %v1671_v9  ;;  %v1720_v50 = vrot.slane %v51_v43, %v1669_v8  ;;  %v1723_v51 = vrot.slane %v51_v43, %v1671_v9  ;;  %v55_v43 = vld [vmem:[#allocation3 + $0x6] ss:$8 sm:$0x3] }
  0x1b   :  { %vm193_vm4 = vcmp.lt.s32.totalorder %v1667_v7, 127  ;;  %vm222_vm5 = vcmp.lt.s32.totalorder %v1667_v7, 113  ;;  %vm251_vm6 = vcmp.lt.s32.totalorder %v1667_v7, 112  ;;  %vm280_vm7 = vcmp.lt.s32.totalorder %v1667_v7, 111 }
  0x1c   :  { %310 = vrot.lane.b32.xlu1 %v1600_v2, %s1510_s21  ;;  %308 = vrot.lane.b32.xlu0 %v1605_v3, %s1510_s21 }
  0x20   :  { %327 = vrot.lane.b32.xlu1 %v1600_v2, %s1509_s16  ;;  %325 = vrot.lane.b32.xlu0 %v1605_v3, %s1509_s16 }
  0x24   :  { %124 = vrot.lane.b32.xlu1 %v1591_v1, %s1511_s27  ;;  %122 = vrot.lane.b32.xlu0 %v1582_v0, %s1511_s27 }
  0x28   :  { %153 = vrot.lane.b32.xlu1 %v1591_v1, %s1512_s0  ;;  %151 = vrot.lane.b32.xlu0 %v1582_v0, %s1512_s0 }
  0x2c   :  { %344 = vrot.lane.b32.xlu1 %v1600_v2, %s1511_s27  ;;  %342 = vrot.lane.b32.xlu0 %v1605_v3, %s1511_s27 }
  0x30   :  { %361 = vrot.lane.b32.xlu1 %v1600_v2, %s1512_s0  ;;  %359 = vrot.lane.b32.xlu0 %v1605_v3, %s1512_s0 }
  0x34   :  { %191 = vrot.lane.b32.xlu1 %v1591_v1, %s1513_s28  ;;  %189 = vrot.lane.b32.xlu0 %v1582_v0, %s1513_s28 }
  0x38   :  { %387 = vrot.lane.b32.xlu1 %v1600_v2, %s1513_s28  ;;  %385 = vrot.lane.b32.xlu0 %v1605_v3, %s1513_s28 }
  0x3c   :  { %220 = vrot.lane.b32.xlu1 %v1591_v1, %s1514_s29  ;;  %218 = vrot.lane.b32.xlu0 %v1582_v0, %s1514_s29 }
  0x40   :  { %249 = vrot.lane.b32.xlu1 %v1591_v1, %s1515_s30  ;;  %247 = vrot.lane.b32.xlu0 %v1582_v0, %s1515_s30 }
  0x44   :  { %404 = vrot.lane.b32.xlu1 %v1600_v2, %s1514_s29  ;;  %402 = vrot.lane.b32.xlu0 %v1605_v3, %s1514_s29 }
  0x48   :  { %421 = vrot.lane.b32.xlu1 %v1600_v2, %s1515_s30  ;;  %419 = vrot.lane.b32.xlu0 %v1605_v3, %s1515_s30 }
  0x4c   :  { %278 = vrot.lane.b32.xlu1 %v1591_v1, %s1517_s9  ;;  %276 = vrot.lane.b32.xlu0 %v1582_v0, %s1517_s9 }
  0x50   :  { %438 = vrot.lane.b32.xlu1 %v1600_v2, %s1517_s9  ;;  %436 = vrot.lane.b32.xlu0 %v1605_v3, %s1517_s9 }
  0x86   :  { %v94_v12 = vpop.permute.xlu1 %93  ;;  %v63_v13 = vpop.permute.xlu0 %62 }
  0x8a   :  { %v96_v18 = vpop.permute.xlu1 %95  ;;  %v65_v19 = vpop.permute.xlu0 %64 }
  0x8b   :  { %v98_v20 = vsel %vm97_vm0, %v94_v12, %v96_v18  ;;  %v99_v21 = vsel %vm97_vm0, %v96_v18, %v94_v12  ;;  %v69_v22 = vsel %vm68_vm1, %v63_v13, %v65_v19  ;;  %v70_v23 = vsel %vm68_vm1, %v65_v19, %v63_v13 }
  0x8c   :  { %v111_v24 = vmul.f32 %v1676_v14, %v99_v21  ;;  %v82_v25 = vmul.f32 %v1679_v15, %v70_v23  ;;  %v83_v26 = vmul.f32 %v1682_v16, %v69_v22  ;;  %v112_v27 = vmul.f32 %v1685_v17, %v98_v20 }
  0x8d   :  { %v1747_v21 = vrot.slane %v53_v10, %v1669_v8  ;;  %v1750_v22 = vrot.slane %v53_v10, %v1671_v9 }
  0x8e   :  { %v311_v28 = vpop.permute.xlu1 %310  ;;  %v309_v29 = vpop.permute.xlu0 %308  ;;  %v1402_v30 = vpack.c.bf16 %v112_v27, %v83_v26  ;;  %v1401_v31 = vpack.c.bf16 %v111_v24, %v82_v25 }
  0x8f   :  { %v312_v32 = vsel %vm68_vm1, %v309_v29, %v311_v28  ;;  %v313_v33 = vsel %vm68_vm1, %v311_v28, %v309_v29 }
  0x90   :  { %579 = vmatprep.subr.bf16.mxu0 %v1402_v30  ;;  %v314_v38 = vmul.f32 %v313_v33, %v1679_v15  ;;  %v315_v41 = vmul.f32 %v312_v32, %v1682_v16 }
  0x91   :  { %580 = vmatpush1.bf16.msra.mxu0 %v1401_v31 }
  0x92   :  { %v328_v34 = vpop.permute.xlu1 %327  ;;  %v326_v35 = vpop.permute.xlu0 %325 }
  0x93   :  { %v329_v36 = vsel %vm97_vm0, %v326_v35, %v328_v34  ;;  %v330_v37 = vsel %vm97_vm0, %v328_v34, %v326_v35 }
  0x94   :  { %v331_v39 = vmul.f32 %v330_v37, %v1676_v14  ;;  %v332_v42 = vmul.f32 %v329_v36, %v1685_v17 }
  0x96   :  { %v125_v44 = vpop.permute.xlu1 %124  ;;  %v123_v45 = vpop.permute.xlu0 %122  ;;  %v1404_v46 = vpack.c.bf16 %v332_v42, %v315_v41  ;;  %v1403_v47 = vpack.c.bf16 %v331_v39, %v314_v38 }
  0x97   :  { %v127_v52 = vsel %vm126_vm2, %v123_v45, %v125_v44  ;;  %v128_v53 = vsel %vm126_vm2, %v125_v44, %v123_v45  ;;  %v57_v44 = vld [vmem:[#allocation3 + $0x7] ss:$8 sm:$0x3] }
  0x98   :  { %620 = vmatprep.subr.bf16.mxu1 %v1404_v46  ;;  %v140_v58 = vmul.f32 %v1713_v48, %v128_v53  ;;  %v141_v59 = vmul.f32 %v1716_v49, %v127_v52  ;;  %v1777_v52 = vrot.slane %v55_v43, %v1671_v9  ;;  %v1781_v53 = vrot.slane %v57_v44, %v1669_v8 }
  0x99   :  { %621 = vmatpush1.bf16.msra.mxu1 %v1403_v47  ;;  %v1774_v47 = vrot.slane %v55_v43, %v1669_v8 }
  0x9a   :  { %v154_v54 = vpop.permute.xlu1 %153  ;;  %v152_v55 = vpop.permute.xlu0 %151 }
  0x9b   :  { %v156_v56 = vsel %vm155_vm3, %v152_v55, %v154_v54  ;;  %v157_v57 = vsel %vm155_vm3, %v154_v54, %v152_v55  ;;  %v1784_v54 = vrot.slane %v57_v44, %v1671_v9 }
  0x9c   :  { %v169_v60 = vmul.f32 %v1720_v50, %v157_v57  ;;  %v170_v61 = vmul.f32 %v1723_v51, %v156_v56 }
  0x9e   :  { %v345_v62 = vpop.permute.xlu1 %344  ;;  %v343_v63 = vpop.permute.xlu0 %342  ;;  %v1406_v5 = vpack.c.bf16 %v170_v61, %v141_v59  ;;  %v1405_v6 = vpack.c.bf16 %v169_v60, %v140_v58 }
  0x9f   :  { %v346_v11 = vsel %vm126_vm2, %v343_v63, %v345_v62  ;;  %v347_v12 = vsel %vm126_vm2, %v345_v62, %v343_v63 }
  0xa0   :  { %581 = vmatprep.subr.bf16.mxu0 %v1406_v5  ;;  %v348_v23 = vmul.f32 %v347_v12, %v1713_v48  ;;  %v349_v24 = vmul.f32 %v346_v11, %v1716_v49  ;;  %v59_v11 = vld [vmem:[#allocation3 + $0x10] ss:$8 sm:$0x3] }
  0xa1   :  { %582 = vmatpush1.bf16.msra.mxu0 %v1405_v6 }
  0xa2   :  { %v362_v13 = vpop.permute.xlu1 %361  ;;  %v360_v18 = vpop.permute.xlu0 %359 }
  0xa3   :  { %v363_v19 = vsel %vm155_vm3, %v360_v18, %v362_v13  ;;  %v364_v20 = vsel %vm155_vm3, %v362_v13, %v360_v18 }
  0xa4   :  { %v365_v25 = vmul.f32 %v364_v20, %v1720_v50  ;;  %v366_v26 = vmul.f32 %v363_v19, %v1723_v51 }
  0xa6   :  { %v192_v27 = vpop.permute.xlu1 %191  ;;  %v190_v28 = vpop.permute.xlu0 %189  ;;  %v1408_v29 = vpack.c.bf16 %v366_v26, %v349_v24  ;;  %v1407_v30 = vpack.c.bf16 %v365_v25, %v348_v23  ;;  %v1808_v24 = vrot.slane %v59_v11, %v1669_v8  ;;  %v1811_v25 = vrot.slane %v59_v11, %v1671_v9 }
  0xa7   :  { %v194_v31 = vsel %vm193_vm4, %v190_v28, %v192_v27  ;;  %v195_v32 = vsel %vm193_vm4, %v192_v27, %v190_v28 }
  0xa8   :  { %v207_v33 = vmul.f32 %v1747_v21, %v194_v31  ;;  %v208_v34 = vmul.f32 %v1750_v22, %v195_v32  ;;  %622 = vmatprep.subr.bf16.mxu1 %v1408_v29 }
  0xa9   :  { %623 = vmatpush1.bf16.msra.mxu1 %v1407_v30 }
  0xaa   :  { %v388_v35 = vpop.permute.xlu1 %387  ;;  %v386_v36 = vpop.permute.xlu0 %385  ;;  %v1410_v37 = vpack.c.bf16 %v208_v34, %v1591_v1  ;;  %v1409_v38 = vpack.c.bf16 %v207_v33, %v1582_v0 }
  0xab   :  { %v389_v39 = vsel %vm193_vm4, %v386_v36, %v388_v35  ;;  %v390_v40 = vsel %vm193_vm4, %v388_v35, %v386_v36 }
  0xac   :  { %v391_v41 = vmul.f32 %v389_v39, %v1747_v21  ;;  %v392_v42 = vmul.f32 %v390_v40, %v1750_v22  ;;  %583 = vmatprep.subr.bf16.mxu0 %v1410_v37 }
  0xad   :  { %584 = vmatpush1.bf16.msra.mxu0 %v1409_v38 }
  0xae   :  { %v221_v45 = vpop.permute.xlu1 %220  ;;  %v219_v1 = vpop.permute.xlu0 %218  ;;  %v1412_v0 = vpack.c.bf16 %v392_v42, %v1600_v2  ;;  %v1411_v46 = vpack.c.bf16 %v391_v41, %v1605_v3 }
  0xaf   :  { %v223_v2 = vsel %vm222_vm5, %v219_v1, %v221_v45  ;;  %v224_v3 = vsel %vm222_vm5, %v221_v45, %v219_v1  ;;  %v453_v45 = vld [vmem:[%s2050_s2] sm:$0xf] }
  0xb0   :  { %624 = vmatprep.subr.bf16.mxu1 %v1412_v0  ;;  %v236_v59 = vmul.f32 %v1774_v47, %v223_v2  ;;  %v237_v60 = vmul.f32 %v1777_v52, %v224_v3 }
  0xb1   :  { %625 = vmatpush1.bf16.msra.mxu1 %v1411_v46 }
  0xb2   :  { %v250_v55 = vpop.permute.xlu1 %249  ;;  %v248_v56 = vpop.permute.xlu0 %247 }
  0xb3   :  { %v252_v57 = vsel %vm251_vm6, %v248_v56, %v250_v55  ;;  %v253_v58 = vsel %vm251_vm6, %v250_v55, %v248_v56 }
  0xb4   :  { %v265_v61 = vmul.f32 %v1781_v53, %v252_v57  ;;  %v266_v62 = vmul.f32 %v1784_v54, %v253_v58 }
  0xb6   :  { %v405_v63 = vpop.permute.xlu1 %404  ;;  %v403_v5 = vpop.permute.xlu0 %402  ;;  %v1414_v6 = vpack.c.bf16 %v266_v62, %v237_v60  ;;  %v1413_v10 = vpack.c.bf16 %v265_v61, %v236_v59 }
  0xb7   :  { %v406_v12 = vsel %vm222_vm5, %v403_v5, %v405_v63  ;;  %v407_v13 = vsel %vm222_vm5, %v405_v63, %v403_v5 }
  0xb8   :  { %585 = vmatprep.subr.bf16.mxu0 %v1414_v6  ;;  %v408_v26 = vmul.f32 %v406_v12, %v1774_v47  ;;  %v409_v27 = vmul.f32 %v407_v13, %v1777_v52 }
  0xb9   :  { %586 = vmatpush1.bf16.msra.mxu0 %v1413_v10 }
  0xba   :  { %v422_v18 = vpop.permute.xlu1 %421  ;;  %v420_v19 = vpop.permute.xlu0 %419 }
  0xbb   :  { %v423_v20 = vsel %vm251_vm6, %v420_v19, %v422_v18  ;;  %v424_v23 = vsel %vm251_vm6, %v422_v18, %v420_v19 }
  0xbc   :  { %v425_v28 = vmul.f32 %v423_v20, %v1781_v53  ;;  %v426_v29 = vmul.f32 %v424_v23, %v1784_v54 }
  0xbe   :  { %v279_v30 = vpop.permute.xlu1 %278  ;;  %v277_v31 = vpop.permute.xlu0 %276  ;;  %v1416_v32 = vpack.c.bf16 %v426_v29, %v409_v27  ;;  %v1415_v33 = vpack.c.bf16 %v425_v28, %v408_v26 }
  0xbf   :  { %v281_v34 = vsel %vm280_vm7, %v277_v31, %v279_v30  ;;  %v282_v8 = vsel %vm280_vm7, %v279_v30, %v277_v31 }
  0xc0   :  { %v294_v9 = vmul.f32 %v1808_v24, %v281_v34  ;;  %v295_v35 = vmul.f32 %v1811_v25, %v282_v8  ;;  %626 = vmatprep.subr.bf16.mxu1 %v1416_v32  ;;  %v680_v8 = vld [vmem:[%s2051_s3] sm:$0xff] }
  0xc1   :  { %627 = vmatpush1.bf16.msra.mxu1 %v1415_v33 }
  0xc2   :  { %v1417_v36 = vpack.c.bf16 %v294_v9, %v294_v9  ;;  %v1418_v37 = vpack.c.bf16 %v295_v35, %v295_v35  ;;  %v439_v38 = vpop.permute.xlu1 %438  ;;  %v437_v39 = vpop.permute.xlu0 %436 }
  0xc3   :  { %v440_v40 = vsel %vm280_vm7, %v437_v39, %v439_v38  ;;  %v441_v41 = vsel %vm280_vm7, %v439_v38, %v437_v39 }
  0xc4   :  { %v442_v42 = vmul.f32 %v440_v40, %v1808_v24  ;;  %v443_v43 = vmul.f32 %v441_v41, %v1811_v25  ;;  %1319 = vmatprep.subr.msk.bf16.mxu0 %vm566_vm8, %v1418_v37  ;;  %v568_v44 = vsel %vm566_vm8, %v1417_v36, 0 }
  0xc5   :  { %588 = vmatpush1.bf16.msra.mxu0 %v568_v44 }
  0xc6   :  { %v1419_v1 = vpack.c.bf16 %v442_v42, %v442_v42  ;;  %v1420_v0 = vpack.c.bf16 %v443_v43, %v443_v43 }
  0xc8   :  { %1320 = vmatmul.mubr.msk.bf16.vlgmr.msra.gmra.mrb[0].mxu0 %vm562_vm9, %v453_v45  ;;  %1321 = vmatprep.subr.msk.bf16.mxu1 %vm566_vm8, %v1420_v0  ;;  %v574_v46 = vsel %vm566_vm8, %v1419_v1, 0 }
  0xc9   :  { %629 = vmatpush1.bf16.msra.mxu1 %v574_v46  ;;  %1157 = vmatprep.mubr.bf16.mxu0 %v1516_v4 }
  0xcc   :  { %1322 = vmatmul.mubr.msk.bf16.vlgmr.msra.gmra.mrb[0].mxu1 %vm562_vm9, %v453_v45 }
  0xcd   :  { %1198 = vmatprep.mubr.bf16.mxu1 %v1516_v4  ;;  %v697_v4 = vld [vmem:[%s2052_s4] sm:$0xff] }
 0x19b   :  { %v613_v2 = vpop.f32.mrb[0].mxu0 }
 0x19c   :  { %v667_v3 = vmul.f32 %v613_v2, %v613_v2  ;;  %v615_v55 = vpop.f32.mrb[1].mxu0 }
 0x19d   :  { %v661_v56 = vadd.f32 %v615_v55, %v613_v2  ;;  %v668_v57 = vmul.f32 %v615_v55, %v615_v55  ;;  %v617_v58 = vpop.f32.mrb[2].mxu0 }
 0x19e   :  { %v618_v59 = vpop.f32.mrb[3].mxu0 }
 0x19f   :  { %v654_v60 = vpop.f32.mrb[0].mxu1  ;;  %v671_v61 = vadd.f32 %v668_v57, %v667_v3 }
 0x1a0   :  { %v669_v62 = vmul.f32 %v654_v60, %v654_v60  ;;  %v656_v63 = vpop.f32.mrb[1].mxu1  ;;  %v662_v5 = vadd.f32 %v661_v56, %v654_v60 }
 0x1a1   :  { %v658_v6 = vpop.f32.mrb[2].mxu1  ;;  %v670_v10 = vmul.f32 %v656_v63, %v656_v63 }
 0x1a2   :  { %v659_v11 = vpop.f32.mrb[3].mxu1  ;;  %v663_v12 = vadd.f32 %v662_v5, %v656_v63  ;;  %v672_v13 = vadd.f32 %v671_v61, %v669_v62 }
 0x1a4   :  { %664 = vadd.xlane.f32.xlu0 %v663_v12  ;;  %v673_v18 = vadd.f32 %v672_v13, %v670_v10 }
 0x1a6   :  { %674 = vadd.xlane.f32.xlu1 %v673_v18 }
 0x1b7   :  { %700 = vperm.xlu1 %1454, %v697_v4  }
 0x231   :  { %v665_v19 = vpop.xlane.xlu0 %664 }
 0x232   :  { %v666_v20 = vmul.f32 0.001953125, %v665_v19 }
 0x233   :  { %v675_v23 = vpop.xlane.xlu1 %674 }
 0x234   :  { %v676_v26 = vmul.f32 0.001953125, %v675_v23  ;;  %v677_v27 = vmul.f32 %v666_v20, %v666_v20  ;;  %v684_v28 = vsub.f32 %v613_v2, %v666_v20  ;;  %v685_v29 = vsub.f32 %v615_v55, %v666_v20 }
 0x235   :  { %v686_v30 = vsub.f32 %v654_v60, %v666_v20  ;;  %v687_v31 = vsub.f32 %v656_v63, %v666_v20 }
 0x236   :  { %v678_v32 = vsub.f32 %v676_v26, %v677_v27 }
 0x237   :  { %v701_v37 = vpop.permute.xlu1 %700 }
 0x238   :  { %v679_v33 = vmax.f32 %v678_v32, 0.0 }
 0x23a   :  { %v681_v34 = vadd.f32 1e-05, %v679_v33 }
 0x23c   :  { %1455 = vrsqrt.f32 %v681_v34 }
 0x246   :  { %v1456_v9 = vpop.eup %1455 }
 0x247   :  { %v683_v35 = vmul.f32 %v1456_v9, %v680_v8 }
 0x249   :  { %690 = vperm.xlu0 %1453, %v683_v35  }
 0x2c8   :  { %v691_v36 = vpop.permute.xlu0 %690 }
 0x2c9   :  { %v693_v38 = vmul.f32 %v691_v36, %v684_v28  ;;  %v694_v39 = vmul.f32 %v691_v36, %v685_v29  ;;  %v695_v40 = vmul.f32 %v691_v36, %v686_v30  ;;  %v696_v0 = vmul.f32 %v691_v36, %v687_v31 }
 0x2cb   :  { %v703_v41 = vadd.f32 %v701_v37, %v693_v38  ;;  %v705_v42 = vadd.f32 %v701_v37, %v695_v40  ;;  %v704_v43 = vadd.f32 %v701_v37, %v694_v39  ;;  %v706_v46 = vadd.f32 %v701_v37, %v696_v0 }
 0x2cd   :  { %v1846_v44 = vmax.f32 %v703_v41, 0.0  ;;  %v1848_v45 = vmax.f32 %v705_v42, 0.0  ;;  %v1854_v1 = vmax.f32 %v704_v43, 0.0  ;;  %v1872_v2 = vmax.f32 %v706_v46, 0.0 }
 0x2cf   :  { %873 = vrot.lane.b32.xlu0 %v1848_v45, %s1509_s16  ;;  %711 = vrot.lane.b32.xlu1 %v1846_v44, %s1510_s21 }
 0x2d3   :  { %745 = vrot.lane.b32.xlu0 %v1846_v44, %s1511_s27  ;;  %713 = vrot.lane.b32.xlu1 %v1854_v1, %s1510_s21 }
 0x2d7   :  { %762 = vrot.lane.b32.xlu0 %v1846_v44, %s1512_s0  ;;  %728 = vrot.lane.b32.xlu1 %v1846_v44, %s1509_s16 }
 0x2db   :  { %890 = vrot.lane.b32.xlu0 %v1848_v45, %s1511_s27  ;;  %730 = vrot.lane.b32.xlu1 %v1854_v1, %s1509_s16 }
 0x2df   :  { %907 = vrot.lane.b32.xlu0 %v1848_v45, %s1512_s0  ;;  %856 = vrot.lane.b32.xlu1 %v1848_v45, %s1510_s21 }
 0x2e3   :  { %788 = vrot.lane.b32.xlu0 %v1846_v44, %s1513_s28  ;;  %858 = vrot.lane.b32.xlu1 %v1872_v2, %s1510_s21 }
 0x2e7   :  { %933 = vrot.lane.b32.xlu0 %v1848_v45, %s1513_s28  ;;  %875 = vrot.lane.b32.xlu1 %v1872_v2, %s1509_s16 }
 0x2eb   :  { %805 = vrot.lane.b32.xlu0 %v1846_v44, %s1514_s29  ;;  %747 = vrot.lane.b32.xlu1 %v1854_v1, %s1511_s27 }
 0x2ef   :  { %822 = vrot.lane.b32.xlu0 %v1846_v44, %s1515_s30  ;;  %764 = vrot.lane.b32.xlu1 %v1854_v1, %s1512_s0 }
 0x2f3   :  { %950 = vrot.lane.b32.xlu0 %v1848_v45, %s1514_s29  ;;  %892 = vrot.lane.b32.xlu1 %v1872_v2, %s1511_s27 }
 0x2f7   :  { %967 = vrot.lane.b32.xlu0 %v1848_v45, %s1515_s30  ;;  %909 = vrot.lane.b32.xlu1 %v1872_v2, %s1512_s0 }
 0x2fb   :  { %839 = vrot.lane.b32.xlu0 %v1846_v44, %s1517_s9  ;;  %790 = vrot.lane.b32.xlu1 %v1854_v1, %s1513_s28 }
 0x2ff   :  { %984 = vrot.lane.b32.xlu0 %v1848_v45, %s1517_s9  ;;  %935 = vrot.lane.b32.xlu1 %v1872_v2, %s1513_s28 }
 0x303   :  { %807 = vrot.lane.b32.xlu1 %v1854_v1, %s1514_s29 }
 0x307   :  { %824 = vrot.lane.b32.xlu1 %v1854_v1, %s1515_s30 }
 0x30b   :  { %952 = vrot.lane.b32.xlu1 %v1872_v2, %s1514_s29 }
 0x30f   :  { %969 = vrot.lane.b32.xlu1 %v1872_v2, %s1515_s30 }
 0x313   :  { %841 = vrot.lane.b32.xlu1 %v1854_v1, %s1517_s9 }
 0x317   :  { %986 = vrot.lane.b32.xlu1 %v1872_v2, %s1517_s9 }
 0x341   :  { %v874_v3 = vpop.permute.xlu0 %873  ;;  %v712_v55 = vpop.permute.xlu1 %711 }
 0x345   :  { %v714_v56 = vpop.permute.xlu1 %713  ;;  %v746_v57 = vpop.permute.xlu0 %745 }
 0x346   :  { %v715_v59 = vsel %vm68_vm1, %v712_v55, %v714_v56  ;;  %v716_v60 = vsel %vm68_vm1, %v714_v56, %v712_v55 }
 0x347   :  { %v717_v6 = vmul.f32 %v716_v60, %v1679_v15  ;;  %v718_v10 = vmul.f32 %v715_v59, %v1682_v16 }
 0x349   :  { %v729_v58 = vpop.permute.xlu1 %728  ;;  %v763_v61 = vpop.permute.xlu0 %762 }
 0x34d   :  { %v731_v62 = vpop.permute.xlu1 %730  ;;  %v891_v19 = vpop.permute.xlu0 %890 }
 0x34e   :  { %v732_v63 = vsel %vm97_vm0, %v729_v58, %v731_v62  ;;  %v733_v5 = vsel %vm97_vm0, %v731_v62, %v729_v58 }
 0x34f   :  { %v734_v11 = vmul.f32 %v733_v5, %v1676_v14  ;;  %v735_v12 = vmul.f32 %v732_v63, %v1685_v17 }
 0x351   :  { %v1421_v13 = vpack.c.bf16 %v734_v11, %v717_v6  ;;  %v857_v18 = vpop.permute.xlu1 %856  ;;  %v1422_v4 = vpack.c.bf16 %v735_v12, %v718_v10  ;;  %v908_v27 = vpop.permute.xlu0 %907 }
 0x353   :  { %1125 = vmatprep.subr.bf16.mxu0 %v1422_v4 }
 0x354   :  { %1126 = vmatpush1.bf16.msra.mxu0 %v1421_v13 }
 0x355   :  { %v859_v20 = vpop.permute.xlu1 %858  ;;  %v789_v36 = vpop.permute.xlu0 %788 }
 0x356   :  { %v860_v23 = vsel %vm68_vm1, %v857_v18, %v859_v20  ;;  %v861_v26 = vsel %vm68_vm1, %v859_v20, %v857_v18 }
 0x357   :  { %v862_v31 = vmul.f32 %v861_v26, %v1679_v15  ;;  %v863_v32 = vmul.f32 %v860_v23, %v1682_v16 }
 0x359   :  { %v876_v28 = vpop.permute.xlu1 %875  ;;  %v934_v42 = vpop.permute.xlu0 %933 }
 0x35a   :  { %v877_v29 = vsel %vm97_vm0, %v874_v3, %v876_v28  ;;  %v878_v30 = vsel %vm97_vm0, %v876_v28, %v874_v3 }
 0x35b   :  { %v879_v33 = vmul.f32 %v878_v30, %v1676_v14  ;;  %v880_v34 = vmul.f32 %v877_v29, %v1685_v17 }
 0x35d   :  { %v1423_v8 = vpack.c.bf16 %v879_v33, %v862_v31  ;;  %v748_v9 = vpop.permute.xlu1 %747  ;;  %v1424_v35 = vpack.c.bf16 %v880_v34, %v863_v32  ;;  %v806_v59 = vpop.permute.xlu0 %805 }
 0x35e   :  { %v749_v37 = vsel %vm126_vm2, %v746_v57, %v748_v9  ;;  %v750_v38 = vsel %vm126_vm2, %v748_v9, %v746_v57 }
 0x35f   :  { %1166 = vmatprep.subr.bf16.mxu1 %v1424_v35  ;;  %v751_v16 = vmul.f32 %v750_v38, %v1713_v48  ;;  %v752_v17 = vmul.f32 %v749_v37, %v1716_v49 }
 0x360   :  { %1167 = vmatpush1.bf16.msra.mxu1 %v1423_v8 }
 0x361   :  { %v765_v39 = vpop.permute.xlu1 %764 }
 0x362   :  { %v766_v15 = vsel %vm155_vm3, %v763_v61, %v765_v39  ;;  %v767_v14 = vsel %vm155_vm3, %v765_v39, %v763_v61 }
 0x363   :  { %v768_v40 = vmul.f32 %v767_v14, %v1720_v50  ;;  %v769_v41 = vmul.f32 %v766_v15, %v1723_v51 }
 0x365   :  { %v1425_v43 = vpack.c.bf16 %v768_v40, %v751_v16  ;;  %v893_v0 = vpop.permute.xlu1 %892  ;;  %v1426_v46 = vpack.c.bf16 %v769_v41, %v752_v17 }
 0x366   :  { %v894_v3 = vsel %vm126_vm2, %v891_v19, %v893_v0  ;;  %v895_v55 = vsel %vm126_vm2, %v893_v0, %v891_v19 }
 0x367   :  { %1127 = vmatprep.subr.bf16.mxu0 %v1426_v46  ;;  %v896_v60 = vmul.f32 %v895_v55, %v1713_v48  ;;  %v897_v61 = vmul.f32 %v894_v3, %v1716_v49  ;;  %v823_v48 = vpop.permute.xlu0 %822 }
 0x368   :  { %1128 = vmatpush1.bf16.msra.mxu0 %v1425_v43 }
 0x369   :  { %v910_v56 = vpop.permute.xlu1 %909 }
 0x36a   :  { %v911_v57 = vsel %vm155_vm3, %v908_v27, %v910_v56  ;;  %v912_v58 = vsel %vm155_vm3, %v910_v56, %v908_v27 }
 0x36b   :  { %v913_v62 = vmul.f32 %v912_v58, %v1720_v50  ;;  %v914_v63 = vmul.f32 %v911_v57, %v1723_v51  ;;  %v951_v28 = vpop.permute.xlu0 %950 }
 0x36d   :  { %v1427_v5 = vpack.c.bf16 %v913_v62, %v896_v60  ;;  %v791_v6 = vpop.permute.xlu1 %790  ;;  %v1428_v10 = vpack.c.bf16 %v914_v63, %v897_v61  ;;  %v1001_v61 = vld [vmem:[%s2053_s5] sm:$0xf] }
 0x36e   :  { %v792_v11 = vsel %vm193_vm4, %v789_v36, %v791_v6  ;;  %v793_v12 = vsel %vm193_vm4, %v791_v6, %v789_v36 }
 0x36f   :  { %v794_v13 = vmul.f32 %v792_v11, %v1747_v21  ;;  %v795_v18 = vmul.f32 %v793_v12, %v1750_v22  ;;  %1168 = vmatprep.subr.bf16.mxu1 %v1428_v10  ;;  %v968_v33 = vpop.permute.xlu0 %967 }
 0x370   :  { %1169 = vmatpush1.bf16.msra.mxu1 %v1427_v5 }
 0x371   :  { %v1429_v49 = vpack.c.bf16 %v794_v13, %v1846_v44  ;;  %v936_v50 = vpop.permute.xlu1 %935  ;;  %v1430_v51 = vpack.c.bf16 %v795_v18, %v1854_v1 }
 0x372   :  { %v937_v4 = vsel %vm193_vm4, %v934_v42, %v936_v50  ;;  %v938_v19 = vsel %vm193_vm4, %v936_v50, %v934_v42 }
 0x373   :  { %v939_v20 = vmul.f32 %v937_v4, %v1747_v21  ;;  %v940_v23 = vmul.f32 %v938_v19, %v1750_v22  ;;  %1129 = vmatprep.subr.bf16.mxu0 %v1430_v51  ;;  %v840_v15 = vpop.permute.xlu0 %839 }
 0x374   :  { %1130 = vmatpush1.bf16.msra.mxu0 %v1429_v49 }
 0x375   :  { %v1431_v26 = vpack.c.bf16 %v939_v20, %v1848_v45  ;;  %v808_v27 = vpop.permute.xlu1 %807  ;;  %v1432_v44 = vpack.c.bf16 %v940_v23, %v1872_v2 }
 0x376   :  { %v809_v1 = vsel %vm222_vm5, %v806_v59, %v808_v27  ;;  %v810_v29 = vsel %vm222_vm5, %v808_v27, %v806_v59  ;;  %v1243_v27 = vld [vmem:[%s2055_s7] sm:$0xff]  ;;  %s1518_s7 = smov [#allocation6]  }
 0x377   :  { %1170 = vmatprep.subr.bf16.mxu1 %v1432_v44  ;;  %v811_v45 = vmul.f32 %v809_v1, %v1774_v47  ;;  %v812_v2 = vmul.f32 %v810_v29, %v1777_v52  ;;  %s1267_s20 = sshll.u32 %s1518_s7, 4  ;;  %s1268_s20 = int_to_ptr.vmem [resolvable:$true] %s1267_s20 }
 0x378   :  { %1171 = vmatpush1.bf16.msra.mxu1 %v1431_v26  ;;  %p1486_p9 = scmp.lt.s32.totalorder %s1268_s20, %s1268_s20 }
 0x379   :  { %v825_v30 = vpop.permute.xlu1 %824 }
 0x37a   :  { %v826_v21 = vsel %vm251_vm6, %v823_v48, %v825_v30  ;;  %v827_v22 = vsel %vm251_vm6, %v825_v30, %v823_v48 }
 0x37b   :  { %v828_v31 = vmul.f32 %v826_v21, %v1781_v53  ;;  %v829_v32 = vmul.f32 %v827_v22, %v1784_v54 }
 0x37d   :  { %v1433_v34 = vpack.c.bf16 %v828_v31, %v811_v45  ;;  %v953_v8 = vpop.permute.xlu1 %952  ;;  %v1434_v9 = vpack.c.bf16 %v829_v32, %v812_v2 }
 0x37e   :  { %v954_v35 = vsel %vm222_vm5, %v951_v28, %v953_v8  ;;  %v955_v36 = vsel %vm222_vm5, %v953_v8, %v951_v28 }
 0x37f   :  { %1131 = vmatprep.subr.bf16.mxu0 %v1434_v9  ;;  %v956_v14 = vmul.f32 %v954_v35, %v1774_v47  ;;  %v957_v16 = vmul.f32 %v955_v36, %v1777_v52  ;;  %v985_v47 = vpop.permute.xlu0 %984 }
 0x380   :  { %1132 = vmatpush1.bf16.msra.mxu0 %v1433_v34  ;;  %v1226_v34 = vld [vmem:[%s2054_s6] sm:$0xff]  ;;  %s1481_s6 = scalar_lea.vmem %s1268_s20, 512 }
 0x381   :  { %v970_v37 = vpop.permute.xlu1 %969  ;;  %p1482_p8 = scmp.ne.s32.totalorder %s1268_s20, %s1481_s6  ;;  %p1487_p10 = scmp.lt.s32.totalorder %s1481_s6, %s1481_s6 }
 0x382   :  { %v971_v38 = vsel %vm251_vm6, %v968_v33, %v970_v37  ;;  %v972_v39 = vsel %vm251_vm6, %v970_v37, %v968_v33 }
 0x383   :  { %v973_v17 = vmul.f32 %v971_v38, %v1781_v53  ;;  %v974_v40 = vmul.f32 %v972_v39, %v1784_v54  ;;  %p1488_p11 = por %p1487_p10, %p1486_p9 }
 0x385   :  { %v1435_v41 = vpack.c.bf16 %v973_v17, %v956_v14  ;;  %v842_v42 = vpop.permute.xlu1 %841  ;;  %v1436_v43 = vpack.c.bf16 %v974_v40, %v957_v16  ;;  %p1489_p12 = pnand %p1488_p11, %p1482_p8 }
 0x386   :  { %v843_v0 = vsel %vm280_vm7, %v840_v15, %v842_v42  ;;  %v844_v46 = vsel %vm280_vm7, %v842_v42, %v840_v15 }
 0x387   :  { %v845_v3 = vmul.f32 %v843_v0, %v1808_v24  ;;  %v846_v55 = vmul.f32 %v844_v46, %v1811_v25  ;;  %1172 = vmatprep.subr.bf16.mxu1 %v1436_v43 }
 0x388   :  { %1173 = vmatpush1.bf16.msra.mxu1 %v1435_v41 }
 0x389   :  { %v1437_v52 = vpack.c.bf16 %v845_v3, %v845_v3  ;;  %v1438_v53 = vpack.c.bf16 %v846_v55, %v846_v55  ;;  %v987_v56 = vpop.permute.xlu1 %986 }
 0x38a   :  { %v988_v54 = vsel %vm280_vm7, %v985_v47, %v987_v56  ;;  %v989_v57 = vsel %vm280_vm7, %v987_v56, %v985_v47 }
 0x38b   :  { %v990_v58 = vmul.f32 %v988_v54, %v1808_v24  ;;  %v991_v59 = vmul.f32 %v989_v57, %v1811_v25  ;;  %1361 = vmatprep.subr.msk.bf16.mxu0 %vm566_vm8, %v1438_v53  ;;  %v1114_v60 = vsel %vm566_vm8, %v1437_v52, 0 }
 0x38c   :  { %1134 = vmatpush1.bf16.msra.mxu0 %v1114_v60 }
 0x38d   :  { %v1439_v62 = vpack.c.bf16 %v990_v58, %v990_v58  ;;  %v1440_v63 = vpack.c.bf16 %v991_v59, %v991_v59 }
 0x38f   :  { %1362 = vmatmul.mubr.msk.bf16.vlgmr.msra.gmra.mrb[4].mxu0 %vm562_vm9, %v1001_v61  ;;  %1363 = vmatprep.subr.msk.bf16.mxu1 %vm566_vm8, %v1440_v63  ;;  %v1120_v7 = vsel %vm566_vm8, %v1439_v62, 0 }
 0x390   :  { %1175 = vmatpush1.bf16.msra.mxu1 %v1120_v7 }
 0x393   :  { %1364 = vmatmul.mubr.msk.bf16.vlgmr.msra.gmra.mrb[4].mxu1 %vm562_vm9, %v1001_v61 }
 0x462   :  { %v1159_v24 = vpop.f32.mrb[4].mxu0 }
 0x463   :  { %v1213_v25 = vmul.f32 %v1159_v24, %v1159_v24  ;;  %v1161_v5 = vpop.f32.mrb[5].mxu0 }
 0x464   :  { %v1207_v6 = vadd.f32 %v1161_v5, %v1159_v24  ;;  %v1214_v10 = vmul.f32 %v1161_v5, %v1161_v5  ;;  %v1163_v11 = vpop.f32.mrb[6].mxu0 }
 0x465   :  { %v1164_v12 = vpop.f32.mrb[7].mxu0 }
 0x466   :  { %v1200_v13 = vpop.f32.mrb[4].mxu1  ;;  %v1217_v18 = vadd.f32 %v1214_v10, %v1213_v25 }
 0x467   :  { %v1215_v48 = vmul.f32 %v1200_v13, %v1200_v13  ;;  %v1202_v49 = vpop.f32.mrb[5].mxu1  ;;  %v1208_v50 = vadd.f32 %v1207_v6, %v1200_v13 }
 0x468   :  { %v1204_v51 = vpop.f32.mrb[6].mxu1  ;;  %v1216_v4 = vmul.f32 %v1202_v49, %v1202_v49 }
 0x469   :  { %v1205_v19 = vpop.f32.mrb[7].mxu1  ;;  %v1209_v20 = vadd.f32 %v1208_v50, %v1202_v49  ;;  %v1218_v23 = vadd.f32 %v1217_v18, %v1215_v48 }
 0x46b   :  { %1210 = vadd.xlane.f32.xlu0 %v1209_v20  ;;  %v1219_v26 = vadd.f32 %v1218_v23, %v1216_v4 }
 0x46d   :  { %1220 = vadd.xlane.f32.xlu1 %v1219_v26 }
 0x47e   :  { %1246 = vperm.xlu1 %1454, %v1243_v27  }
 0x4f8   :  { %v1211_v44 = vpop.xlane.xlu0 %1210 }
 0x4f9   :  { %v1212_v28 = vmul.f32 0.001953125, %v1211_v44 }
 0x4fa   :  { %v1221_v1 = vpop.xlane.xlu1 %1220 }
 0x4fb   :  { %v1222_v29 = vmul.f32 0.001953125, %v1221_v1  ;;  %v1223_v30 = vmul.f32 %v1212_v28, %v1212_v28  ;;  %v1230_v21 = vsub.f32 %v1159_v24, %v1212_v28  ;;  %v1231_v22 = vsub.f32 %v1161_v5, %v1212_v28 }
 0x4fc   :  { %v1232_v45 = vsub.f32 %v1200_v13, %v1212_v28  ;;  %v1233_v2 = vsub.f32 %v1202_v49, %v1212_v28 }
 0x4fd   :  { %v1224_v31 = vsub.f32 %v1222_v29, %v1223_v30 }
 0x4fe   :  { %v1247_v15 = vpop.permute.xlu1 %1246 }
 0x4ff   :  { %v1225_v32 = vmax.f32 %v1224_v31, 0.0 }
 0x501   :  { %v1227_v33 = vadd.f32 1e-05, %v1225_v32 }
 0x503   :  { %1457 = vrsqrt.f32 %v1227_v33 }
 0x50d   :  { %v1458_v8 = vpop.eup %1457 }
 0x50e   :  { %v1229_v9 = vmul.f32 %v1458_v8, %v1226_v34 }
 0x510   :  { %1236 = vperm.xlu0 %1453, %v1229_v9  }
 0x58f   :  { %v1237_v35 = vpop.permute.xlu0 %1236 }
 0x590   :  { %v1239_v36 = vmul.f32 %v1237_v35, %v1230_v21  ;;  %v1240_v37 = vmul.f32 %v1237_v35, %v1231_v22  ;;  %v1241_v38 = vmul.f32 %v1237_v35, %v1232_v45  ;;  %v1242_v39 = vmul.f32 %v1237_v35, %v1233_v2 }
 0x592   :  { %v1249_v14 = vadd.f32 %v1247_v15, %v1239_v36  ;;  %v1250_v16 = vadd.f32 %v1247_v15, %v1240_v37  ;;  %v1251_v17 = vadd.f32 %v1247_v15, %v1241_v38  ;;  %v1252_v40 = vadd.f32 %v1247_v15, %v1242_v39 }
 0x594   :  { %v1253_v41 = vmax.f32 %v1249_v14, 0.0  ;;  %v1254_v42 = vmax.f32 %v1250_v16, 0.0  ;;  %v1255_v43 = vmax.f32 %v1251_v17, 0.0  ;;  %v1256_v0 = vmax.f32 %v1252_v40, 0.0 }
 0x596   :  { %1257 = vst [vmem:[#allocation6] sm:$0xff] %v1253_v41  ;;  %1258 = vst [vmem:[#allocation6 + $0x8] sm:$0xff] %v1254_v42 }
 0x597   :  { %1260 = vst [vmem:[#allocation6 + $0x10] sm:$0xff] %v1255_v43  ;;  %1261 = vst [vmem:[#allocation6 + $0x18] sm:$0xff] %v1256_v0 }
 0x598   :  { %1492 = shalt.err (!%p1489_p12)
}
 0x599   :  { %s1493_s23 = scalar_lea.hbm %s2056_s8, 512 }
 0x59a   :  { %p1494_p13 = scmp.ne.s32.totalorder %s2056_s8, %s1493_s23  ;;  %p1497_p0 = scmp.lt.u32.totalorder %s1493_s23, %s2056_s8 }
 0x59c   :  { %p1499_p1 = pnand %p1497_p0, %p1494_p13 }
 0x59e   :  { %1502 = shalt.err (!%p1499_p1)
}
 0x59f   :  { %1273 = dma.vmem_to_hbm [thread:$0]  %s1268_s20, 512, %s2056_s8, [#allocation5], %s1508_s15, %s1508_s15, %s1509_s16  }
 0x5a0   :  { %1505 = dma.done.wait [#allocation5], 512  }
 0x5a1   :  { %1506 = vsyncadd [#allocation5], 4294966784 }
 0x5a2   :  { %1277 = vsyncpa [#allocation4], 1 }
 0x5a3   :  { %1278 = vsyncpa [#allocation5], 1 }

</bundles_post_ra>
